<compile_context>
chip_gen: v6e
topology: v6e:2x2x1
jax: 0.10.0
libtpu: 0.0.40
codegen_flags: <defaults>
</compile_context>

<pallas_src>
import jax
import jax.numpy as jnp
from jax.experimental import pallas as pl
from jax.experimental.pallas import tpu as pltpu

EPS = 1e-5


def _nonlocal_kernel(x_ref, wcat_ref, bcat_ref, ww_ref, bw_ref,
                     gamma_ref, beta_ref, gavg_ref, out_ref):
    x = x_ref[0]                                   # (N, C), window-member-major token order
    N, C = x.shape
    Ci = wcat_ref.shape[1] // 3
    Np = N // 4                                    # tokens per pooled map

    # ---- fused theta | g | phi projection: one wide MXU op -------------------
    proj = jnp.dot(x, wcat_ref[...], preferred_element_type=jnp.float32) + bcat_ref[...]  # (N, 3Ci)
    theta = proj[:, :Ci]                           # (N, Ci) full-resolution queries
    gphi = proj[:, Ci:]                            # (N, 2Ci) = [g | phi] pre-pool
    # 2x2 max-pool == max over the 4 window-member row blocks (bias already added:
    # per-channel constant commutes with max).
    p01 = jnp.maximum(gphi[0 * Np:1 * Np], gphi[1 * Np:2 * Np])
    p23 = jnp.maximum(gphi[2 * Np:3 * Np], gphi[3 * Np:4 * Np])
    gp = jnp.maximum(p01, p23)                     # (Np, 2Ci)
    g_p = gp[:, :Ci]                               # (Np, Ci)
    phi_p = gp[:, Ci:]                             # (Np, Ci)

    # ---- attention: f = theta @ phi^T -> softmax -> y = attn @ g -------------
    f = jax.lax.dot_general(theta, phi_p, (((1,), (1,)), ((), ())),
                            preferred_element_type=jnp.float32)       # (N, Np)
    f = jnp.exp(f - jnp.max(f, axis=-1, keepdims=True))
    row_sum = jnp.sum(f, axis=-1, keepdims=True)                      # (N, 1)
    r = pl.reciprocal(row_sum, approx=True)                           # EUP slot
    r = r * (2.0 - row_sum * r)                    # one Newton step: error -> e^2 (cheap column op)
    attn = f * r
    y = jnp.dot(attn, g_p, preferred_element_type=jnp.float32)        # (N, Ci)

    # ---- W: 1x1 conv back to C channels ---------------------------------------
    wy = jnp.dot(y, ww_ref[...], preferred_element_type=jnp.float32) + bw_ref[...]  # (N, C)

    # ---- GroupNorm(G groups) over (channels-in-group, all tokens) ------------
    # gavg is the precomputed (C, C) per-channel group-averaging matrix with the
    # 1/(N*Cg) normalization folded in, so two 1-row dots give mean / E[x^2].
    s1 = jnp.sum(wy, axis=0, keepdims=True)                           # (1, C)
    s2 = jnp.sum(wy * wy, axis=0, keepdims=True)                      # (1, C)
    mean_c = jnp.dot(s1, gavg_ref[...], preferred_element_type=jnp.float32)   # (1, C)
    msq_c = jnp.dot(s2, gavg_ref[...], preferred_element_type=jnp.float32)    # (1, C)
    var_c = jnp.maximum(msq_c - mean_c * mean_c, 0.0)
    scale = jax.lax.rsqrt(var_c + EPS) * gamma_ref[...]               # (1, C)
    shift = beta_ref[...] - mean_c * scale                            # (1, C)

    # normalized + residual (single FMA-shaped pass over the (N, C) slab)
    out_ref[0] = wy * scale + shift + x


def nonlocal_block_pallas(x_nchw, params):
    """x_nchw: (B, C, H, W) float32. Returns z in NCHW."""
    B, C, H, W = x_nchw.shape
    Ci = params["wg"].shape[1]
    G = params["gmat"].shape[1]
    Cg = C // G
    N = H * W
    Hp, Wp = H // 2, W // 2

    # NCHW -> channel-last tokens, permuted window-member-major:
    #   token (2*dh + dw) * Np + ph*Wp + pw  <->  pixel (2*ph+dh, 2*pw+dw)
    x_nhwc = jnp.transpose(x_nchw, (0, 2, 3, 1))                              # (B, H, W, C)
    x_perm = jnp.transpose(x_nhwc.reshape(B, Hp, 2, Wp, 2, C),
                           (0, 2, 4, 1, 3, 5)).reshape(B, N, C)

    # Fused projection weights [theta | g | phi] and biases.
    wcat = jnp.concatenate([params["wth"], params["wg"], params["wphi"]], axis=1)     # (C, 3Ci)
    bcat = jnp.concatenate([params["bth"], params["bg"], params["bphi"]]).reshape(1, 3 * Ci)
    # Group-averaging matrix: gavg[c, c'] = 1/(N*Cg) if group(c) == group(c') else 0.
    gavg = (params["gmat"] @ params["gmat"].T) / float(N * Cg)                        # (C, C)

    full2 = lambda shape: pl.BlockSpec(shape, lambda b: (0, 0))

    z_perm = pl.pallas_call(
        _nonlocal_kernel,
        out_shape=jax.ShapeDtypeStruct((B, N, C), jnp.float32),
        grid=(B,),
        in_specs=[
            pl.BlockSpec((1, N, C), lambda b: (b, 0, 0)),   # x (permuted tokens)
            full2((C, 3 * Ci)),    # wcat  = [wtheta | wg | wphi]
            full2((1, 3 * Ci)),    # bcat
            full2((Ci, C)),        # wW
            full2((1, C)),         # bW
            full2((1, C)),         # gn gamma
            full2((1, C)),         # gn beta
            full2((C, C)),         # group-averaging matrix
        ],
        out_specs=pl.BlockSpec((1, N, C), lambda b: (b, 0, 0)),
        compiler_params=pltpu.CompilerParams(dimension_semantics=("parallel",)),
    )(
        x_perm, wcat, bcat,
        params["wW"], params["bW"].reshape(1, C),
        params["gamma"].reshape(1, C), params["beta"].reshape(1, C),
        gavg,
    )

    # Undo the token permutation, back to NCHW.
    z = jnp.transpose(z_perm.reshape(B, 2, 2, Hp, Wp, C),
                      (0, 3, 1, 4, 2, 5)).reshape(B, H, W, C)
    return jnp.transpose(z, (0, 3, 1, 2))


def nonlocal_block_reference(x_nchw, params):
    """Pure-JAX reference with the same semantics (for verification)."""
    B, C, H, W = x_nchw.shape
    Ci = params["wg"].shape[1]
    G = params["gmat"].shape[1]
    Cg = C // G
    xl = jnp.transpose(x_nchw, (0, 2, 3, 1))                      # (B, H, W, C)

    conv1x1 = lambda v, w, b: jnp.einsum("bhwc,cd->bhwd", v, w) + b
    theta = conv1x1(xl, params["wth"], params["bth"]).reshape(B, H * W, Ci)
    g = conv1x1(xl, params["wg"], params["bg"])
    phi = conv1x1(xl, params["wphi"], params["bphi"])
    pool = lambda v: v.reshape(B, H // 2, 2, W // 2, 2, Ci).max(axis=(2, 4))
    g_p = pool(g).reshape(B, -1, Ci)
    phi_p = pool(phi).reshape(B, -1, Ci)

    f = jnp.einsum("bnd,bmd->bnm", theta, phi_p)
    attn = jax.nn.softmax(f, axis=-1)
    y = jnp.einsum("bnm,bmd->bnd", attn, g_p)                     # (B, N, Ci)
    wy = jnp.einsum("bnd,dc->bnc", y, params["wW"]) + params["bW"]  # (B, N, C)

    wy_g = wy.reshape(B, H * W, G, Cg)
    mean = wy_g.mean(axis=(1, 3), keepdims=True)
    var = wy_g.var(axis=(1, 3), keepdims=True)
    wy_n = (wy_g - mean) / jnp.sqrt(var + EPS)
    wy_n = wy_n.reshape(B, H * W, C) * params["gamma"] + params["beta"]
    z = wy_n + xl.reshape(B, H * W, C)
    return jnp.transpose(z.reshape(B, H, W, C), (0, 3, 1, 2))


def make_params(key, C, Ci, G):
    ks = jax.random.split(key, 8)
    s_in = 1.0 / jnp.sqrt(C)
    s_ci = 1.0 / jnp.sqrt(Ci)
    gmat = (jnp.arange(C)[:, None] // (C // G) == jnp.arange(G)[None, :]).astype(jnp.float32)
    return {
        "wg": jax.random.normal(ks[0], (C, Ci), jnp.float32) * s_in,
        "bg": jax.random.normal(ks[1], (Ci,), jnp.float32) * 0.1,
        "wth": jax.random.normal(ks[2], (C, Ci), jnp.float32) * s_in,
        "bth": jax.random.normal(ks[3], (Ci,), jnp.float32) * 0.1,
        "wphi": jax.random.normal(ks[4], (C, Ci), jnp.float32) * s_in,
        "bphi": jax.random.normal(ks[5], (Ci,), jnp.float32) * 0.1,
        "wW": jax.random.normal(ks[6], (Ci, C), jnp.float32) * s_ci,
        "bW": jax.random.normal(ks[7], (C,), jnp.float32) * 0.1,
        "gamma": jnp.ones((C,), jnp.float32),
        "beta": jnp.zeros((C,), jnp.float32),
        "gmat": gmat,
    }


if __name__ == "__main__":
    B, C, H, W = 2, 64, 16, 16        # C must be divisible by 32 for GroupNorm(32, C)
    Ci, G = C // 2, 32

    key = jax.random.PRNGKey(0)
    kx, kp = jax.random.split(key)
    x = jax.random.normal(kx, (B, C, H, W), jnp.float32)
    params = make_params(kp, C, Ci, G)

    z = jax.block_until_ready(nonlocal_block_pallas(x, params))
    z_ref = jax.block_until_ready(nonlocal_block_reference(x, params))

    assert z.shape == x.shape and z.dtype == x.dtype
    if not jnp.allclose(z, z_ref, rtol=1e-3, atol=1e-3):
        raise AssertionError("Pallas kernel output does not match reference")
    print("KERNEL_OK")
</pallas_src>

<mosaic_0001>
module attributes {stable_mosaic.version = 11 : i64} {
  func.func @_nonlocal_kernel(%arg0: i32, %arg1: memref<1x256x64xf32, #tpu.memory_space<vmem>>, %arg2: memref<64x96xf32, #tpu.memory_space<vmem>>, %arg3: memref<1x96xf32, #tpu.memory_space<vmem>>, %arg4: memref<32x64xf32, #tpu.memory_space<vmem>>, %arg5: memref<1x64xf32, #tpu.memory_space<vmem>>, %arg6: memref<1x64xf32, #tpu.memory_space<vmem>>, %arg7: memref<1x64xf32, #tpu.memory_space<vmem>>, %arg8: memref<64x64xf32, #tpu.memory_space<vmem>>, %arg9: memref<1x256x64xf32, #tpu.memory_space<vmem>>) attributes {dimension_semantics = [#tpu.dimension_semantics<parallel>], iteration_bounds = array<i64: 2>, scalar_prefetch = 0 : i64, scratch_operands = 0 : i64, tpu.core_type = #tpu.core_type<tc>, window_params = [{transform_indices = @transform_0, window_bounds = array<i64: 1, 256, 64>}, {pipeline_mode = #tpu.pipeline_mode<synchronous>, transform_indices = @transform_1, window_bounds = array<i64: 64, 96>}, {pipeline_mode = #tpu.pipeline_mode<synchronous>, transform_indices = @transform_2, window_bounds = array<i64: 1, 96>}, {pipeline_mode = #tpu.pipeline_mode<synchronous>, transform_indices = @transform_3, window_bounds = array<i64: 32, 64>}, {pipeline_mode = #tpu.pipeline_mode<synchronous>, transform_indices = @transform_4, window_bounds = array<i64: 1, 64>}, {pipeline_mode = #tpu.pipeline_mode<synchronous>, transform_indices = @transform_5, window_bounds = array<i64: 1, 64>}, {pipeline_mode = #tpu.pipeline_mode<synchronous>, transform_indices = @transform_6, window_bounds = array<i64: 1, 64>}, {pipeline_mode = #tpu.pipeline_mode<synchronous>, transform_indices = @transform_7, window_bounds = array<i64: 64, 64>}, {transform_indices = @transform_8, window_bounds = array<i64: 1, 256, 64>}]} {
    %c0 = arith.constant 0 : index
    %c0_0 = arith.constant 0 : index
    %c0_1 = arith.constant 0 : index
    %0 = vector.load %arg1[%c0, %c0_0, %c0_1] : memref<1x256x64xf32, #tpu.memory_space<vmem>>, vector<1x256x64xf32>
    %1 = vector.shape_cast %0 : vector<1x256x64xf32> to vector<256x64xf32>
    %c0_2 = arith.constant 0 : index
    %c0_3 = arith.constant 0 : index
    %2 = vector.load %arg2[%c0_2, %c0_3] : memref<64x96xf32, #tpu.memory_space<vmem>>, vector<64x96xf32>
    %cst = arith.constant dense<0.000000e+00> : vector<256x96xf32>
    %3 = tpu.matmul %1, %2, %cst {dimension_numbers = #tpu.dot_dimension_numbers<[1], [0], [0], [1], [0, 0, 1, 1], [], []>} : vector<256x64xf32>, vector<64x96xf32>, vector<256x96xf32> -> vector<256x96xf32>
    %c0_4 = arith.constant 0 : index
    %c0_5 = arith.constant 0 : index
    %4 = vector.load %arg3[%c0_4, %c0_5] : memref<1x96xf32, #tpu.memory_space<vmem>>, vector<1x96xf32>
    %5 = vector.broadcast %4 : vector<1x96xf32> to vector<256x96xf32>
    %6 = arith.addf %3, %5 : vector<256x96xf32>
    %7 = vector.extract_strided_slice %6 {offsets = [0, 0], sizes = [256, 32], strides = [1, 1]} : vector<256x96xf32> to vector<256x32xf32>
    %8 = vector.extract_strided_slice %6 {offsets = [0, 32], sizes = [256, 64], strides = [1, 1]} : vector<256x96xf32> to vector<256x64xf32>
    %9 = vector.extract_strided_slice %8 {offsets = [0, 0], sizes = [64, 64], strides = [1, 1]} : vector<256x64xf32> to vector<64x64xf32>
    %10 = vector.extract_strided_slice %8 {offsets = [64, 0], sizes = [64, 64], strides = [1, 1]} : vector<256x64xf32> to vector<64x64xf32>
    %11 = arith.maximumf %9, %10 : vector<64x64xf32>
    %12 = vector.extract_strided_slice %8 {offsets = [128, 0], sizes = [64, 64], strides = [1, 1]} : vector<256x64xf32> to vector<64x64xf32>
    %13 = vector.extract_strided_slice %8 {offsets = [192, 0], sizes = [64, 64], strides = [1, 1]} : vector<256x64xf32> to vector<64x64xf32>
    %14 = arith.maximumf %12, %13 : vector<64x64xf32>
    %15 = arith.maximumf %11, %14 : vector<64x64xf32>
    %16 = vector.extract_strided_slice %15 {offsets = [0, 0], sizes = [64, 32], strides = [1, 1]} : vector<64x64xf32> to vector<64x32xf32>
    %17 = vector.extract_strided_slice %15 {offsets = [0, 32], sizes = [64, 32], strides = [1, 1]} : vector<64x64xf32> to vector<64x32xf32>
    %cst_6 = arith.constant dense<0.000000e+00> : vector<256x64xf32>
    %18 = tpu.matmul %7, %17, %cst_6 {dimension_numbers = #tpu.dot_dimension_numbers<[1], [1], [0], [0], [0, 0, 1, 0], [], []>} : vector<256x32xf32>, vector<64x32xf32>, vector<256x64xf32> -> vector<256x64xf32>
    %cst_7 = arith.constant dense<0xFF800000> : vector<256xf32>
    %19 = vector.multi_reduction <maximumf>, %18, %cst_7 [1] : vector<256x64xf32> to vector<256xf32>
    %20 = vector.shape_cast %19 : vector<256xf32> to vector<256x1xf32>
    %21 = vector.broadcast %20 : vector<256x1xf32> to vector<256x64xf32>
    %22 = arith.subf %18, %21 : vector<256x64xf32>
    %23 = math.exp %22 : vector<256x64xf32>
    %cst_8 = arith.constant dense<0.000000e+00> : vector<256xf32>
    %24 = vector.multi_reduction <add>, %23, %cst_8 [1] : vector<256x64xf32> to vector<256xf32>
    %25 = vector.shape_cast %24 : vector<256xf32> to vector<256x1xf32>
    %26 = tpu.reciprocal %25 {approx = true} : vector<256x1xf32> -> vector<256x1xf32>
    %27 = arith.mulf %25, %26 : vector<256x1xf32>
    %cst_9 = arith.constant 2.000000e+00 : f32
    %28 = vector.broadcast %cst_9 : f32 to vector<256x1xf32>
    %29 = arith.subf %28, %27 : vector<256x1xf32>
    %30 = arith.mulf %26, %29 : vector<256x1xf32>
    %31 = vector.broadcast %30 : vector<256x1xf32> to vector<256x64xf32>
    %32 = arith.mulf %23, %31 : vector<256x64xf32>
    %cst_10 = arith.constant dense<0.000000e+00> : vector<256x32xf32>
    %33 = tpu.matmul %32, %16, %cst_10 {dimension_numbers = #tpu.dot_dimension_numbers<[1], [0], [0], [1], [0, 0, 1, 1], [], []>} : vector<256x64xf32>, vector<64x32xf32>, vector<256x32xf32> -> vector<256x32xf32>
    %c0_11 = arith.constant 0 : index
    %c0_12 = arith.constant 0 : index
    %34 = vector.load %arg4[%c0_11, %c0_12] : memref<32x64xf32, #tpu.memory_space<vmem>>, vector<32x64xf32>
    %cst_13 = arith.constant dense<0.000000e+00> : vector<256x64xf32>
    %35 = tpu.matmul %33, %34, %cst_13 {dimension_numbers = #tpu.dot_dimension_numbers<[1], [0], [0], [1], [0, 0, 1, 1], [], []>} : vector<256x32xf32>, vector<32x64xf32>, vector<256x64xf32> -> vector<256x64xf32>
    %c0_14 = arith.constant 0 : index
    %c0_15 = arith.constant 0 : index
    %36 = vector.load %arg5[%c0_14, %c0_15] : memref<1x64xf32, #tpu.memory_space<vmem>>, vector<1x64xf32>
    %37 = vector.broadcast %36 : vector<1x64xf32> to vector<256x64xf32>
    %38 = arith.addf %35, %37 : vector<256x64xf32>
    %cst_16 = arith.constant dense<0.000000e+00> : vector<64xf32>
    %39 = vector.multi_reduction <add>, %38, %cst_16 [0] : vector<256x64xf32> to vector<64xf32>
    %40 = vector.shape_cast %39 : vector<64xf32> to vector<1x64xf32>
    %41 = arith.mulf %38, %38 : vector<256x64xf32>
    %cst_17 = arith.constant dense<0.000000e+00> : vector<64xf32>
    %42 = vector.multi_reduction <add>, %41, %cst_17 [0] : vector<256x64xf32> to vector<64xf32>
    %43 = vector.shape_cast %42 : vector<64xf32> to vector<1x64xf32>
    %c0_18 = arith.constant 0 : index
    %c0_19 = arith.constant 0 : index
    %44 = vector.load %arg8[%c0_18, %c0_19] : memref<64x64xf32, #tpu.memory_space<vmem>>, vector<64x64xf32>
    %cst_20 = arith.constant dense<0.000000e+00> : vector<1x64xf32>
    %45 = tpu.matmul %40, %44, %cst_20 {dimension_numbers = #tpu.dot_dimension_numbers<[1], [0], [0], [1], [0, 0, 1, 1], [], []>} : vector<1x64xf32>, vector<64x64xf32>, vector<1x64xf32> -> vector<1x64xf32>
    %c0_21 = arith.constant 0 : index
    %c0_22 = arith.constant 0 : index
    %46 = vector.load %arg8[%c0_21, %c0_22] : memref<64x64xf32, #tpu.memory_space<vmem>>, vector<64x64xf32>
    %cst_23 = arith.constant dense<0.000000e+00> : vector<1x64xf32>
    %47 = tpu.matmul %43, %46, %cst_23 {dimension_numbers = #tpu.dot_dimension_numbers<[1], [0], [0], [1], [0, 0, 1, 1], [], []>} : vector<1x64xf32>, vector<64x64xf32>, vector<1x64xf32> -> vector<1x64xf32>
    %48 = arith.mulf %45, %45 : vector<1x64xf32>
    %49 = arith.subf %47, %48 : vector<1x64xf32>
    %cst_24 = arith.constant 0.000000e+00 : f32
    %50 = vector.broadcast %cst_24 : f32 to vector<1x64xf32>
    %51 = arith.maximumf %49, %50 : vector<1x64xf32>
    %cst_25 = arith.constant 9.99999974E-6 : f32
    %52 = vector.broadcast %cst_25 : f32 to vector<1x64xf32>
    %53 = arith.addf %51, %52 : vector<1x64xf32>
    %54 = math.rsqrt %53 : vector<1x64xf32>
    %c0_26 = arith.constant 0 : index
    %c0_27 = arith.constant 0 : index
    %55 = vector.load %arg6[%c0_26, %c0_27] : memref<1x64xf32, #tpu.memory_space<vmem>>, vector<1x64xf32>
    %56 = arith.mulf %54, %55 : vector<1x64xf32>
    %c0_28 = arith.constant 0 : index
    %c0_29 = arith.constant 0 : index
    %57 = vector.load %arg7[%c0_28, %c0_29] : memref<1x64xf32, #tpu.memory_space<vmem>>, vector<1x64xf32>
    %58 = arith.mulf %45, %56 : vector<1x64xf32>
    %59 = arith.subf %57, %58 : vector<1x64xf32>
    %60 = vector.broadcast %56 : vector<1x64xf32> to vector<256x64xf32>
    %61 = arith.mulf %38, %60 : vector<256x64xf32>
    %62 = vector.broadcast %59 : vector<1x64xf32> to vector<256x64xf32>
    %63 = arith.addf %61, %62 : vector<256x64xf32>
    %64 = arith.addf %63, %1 : vector<256x64xf32>
    %c0_30 = arith.constant 0 : index
    %c0_31 = arith.constant 0 : index
    %c0_32 = arith.constant 0 : index
    %65 = vector.load %arg9[%c0_30, %c0_31, %c0_32] : memref<1x256x64xf32, #tpu.memory_space<vmem>>, vector<1x256x64xf32>
    %66 = vector.shape_cast %65 : vector<1x256x64xf32> to vector<256x64xf32>
    %67 = vector.shape_cast %64 : vector<256x64xf32> to vector<1x256x64xf32>
    tpu.vector_store %arg9[%c0_30, %c0_31, %c0_32], %67 {strides = array<i32>} : memref<1x256x64xf32, #tpu.memory_space<vmem>>, vector<1x256x64xf32>,
    return
  }
  func.func @transform_0(%arg0: i32) -> (i32, i32, i32) {
    %c0_i32 = arith.constant 0 : i32
    %c0_i32_0 = arith.constant 0 : i32
    %c0_i32_1 = arith.constant 0 : i32
    return %arg0, %c0_i32, %c0_i32_0 : i32, i32, i32
  }
  func.func @transform_1(%arg0: i32) -> (i32, i32) {
    %c0_i32 = arith.constant 0 : i32
    %c0_i32_0 = arith.constant 0 : i32
    %c0_i32_1 = arith.constant 0 : i32
    return %c0_i32, %c0_i32_0 : i32, i32
  }
  func.func @transform_2(%arg0: i32) -> (i32, i32) {
    %c0_i32 = arith.constant 0 : i32
    %c0_i32_0 = arith.constant 0 : i32
    %c0_i32_1 = arith.constant 0 : i32
    return %c0_i32, %c0_i32_0 : i32, i32
  }
  func.func @transform_3(%arg0: i32) -> (i32, i32) {
    %c0_i32 = arith.constant 0 : i32
    %c0_i32_0 = arith.constant 0 : i32
    %c0_i32_1 = arith.constant 0 : i32
    return %c0_i32, %c0_i32_0 : i32, i32
  }
  func.func @transform_4(%arg0: i32) -> (i32, i32) {
    %c0_i32 = arith.constant 0 : i32
    %c0_i32_0 = arith.constant 0 : i32
    %c0_i32_1 = arith.constant 0 : i32
    return %c0_i32, %c0_i32_0 : i32, i32
  }
  func.func @transform_5(%arg0: i32) -> (i32, i32) {
    %c0_i32 = arith.constant 0 : i32
    %c0_i32_0 = arith.constant 0 : i32
    %c0_i32_1 = arith.constant 0 : i32
    return %c0_i32, %c0_i32_0 : i32, i32
  }
  func.func @transform_6(%arg0: i32) -> (i32, i32) {
    %c0_i32 = arith.constant 0 : i32
    %c0_i32_0 = arith.constant 0 : i32
    %c0_i32_1 = arith.constant 0 : i32
    return %c0_i32, %c0_i32_0 : i32, i32
  }
  func.func @transform_7(%arg0: i32) -> (i32, i32) {
    %c0_i32 = arith.constant 0 : i32
    %c0_i32_0 = arith.constant 0 : i32
    %c0_i32_1 = arith.constant 0 : i32
    return %c0_i32, %c0_i32_0 : i32, i32
  }
  func.func @transform_8(%arg0: i32) -> (i32, i32, i32) {
    %c0_i32 = arith.constant 0 : i32
    %c0_i32_0 = arith.constant 0 : i32
    %c0_i32_1 = arith.constant 0 : i32
    return %arg0, %c0_i32, %c0_i32_0 : i32, i32, i32
  }
}

</mosaic_0001>

<bundles_post_ra>
// kernel: tpu_custom_call.1
= control target key start
LH: loop header
LB: loop body
LE: loop exit
PB: predicated region body
PF: predicated region fallthrough
CT: control target
= control target key end

     0   :  { %s3557_s27 = smov 0   ;;  %s4833_s0 = inlined_call_operand.vmem [shape: f32[2,256,64], index: 0, kind: input, shape index: {}]   ;;  %s4834_s1 = inlined_call_operand.vmem [shape: f32[64,96], index: 1, kind: input, shape index: {}]   ;;  %s4835_s2 = inlined_call_operand.vmem [shape: f32[1,96], index: 2, kind: input, shape index: {}]   ;;  %s4836_s3 = inlined_call_operand.vmem [shape: f32[32,64], index: 3, kind: input, shape index: {}]   ;;  %s4837_s4 = inlined_call_operand.vmem [shape: f32[1,64], index: 4, kind: input, shape index: {}]   ;;  %s4838_s5 = inlined_call_operand.vmem [shape: f32[1,64], index: 5, kind: input, shape index: {}]   ;;  %s4839_s6 = inlined_call_operand.vmem [shape: f32[1,64], index: 6, kind: input, shape index: {}]   ;;  %s4840_s7 = inlined_call_operand.vmem [shape: f32[64,64], index: 7, kind: input, shape index: {}]   ;;  %s4841_s8 = inlined_call_operand.vmem [shape: f32[2,256,64], index: 8, kind: output, shape index: {}]  }
   0x1 LB: > { %s2713_s28 = sadd.s32 4294967295, %s3506_s27   ;;  %p2717_p0 = scmp.ge.s32.totalorder %s3506_s27, 1  ;;  %s3506_s27 = sphi %s3557_s27, %s18_s27  }
   0x2   : > { %p262_p1 = scmp.lt.s32.totalorder %s3506_s27, 3 }
   0x4   : > { %p263_p2 = pnand %p2717_p0, %p262_p1 }
   0x5   : > { %p296_p3 = scmp.lt.s32.totalorder (!%p263_p2), %s2713_s28, 1  ;;  %s3508_s9 = smov (!%p263_p2), 64  }
   0x6   : > { %266 = sbr.rel (%p263_p2) target bundleno = 1764 (0x6e4), region = 52  ;;  %s3509_s10 = smov (!%p263_p2), 96  }
   0xb   : > { %v345_v0 = vld [vmem:[%s4834_s1 + $0x38] sm:$0xff]  ;;  %v344_v1 = vld [vmem:[%s4834_s1 + $0x30] sm:$0xff]  ;;  %v343_v2 = vld [vmem:[%s4834_s1 + $0x28] sm:$0xff]  ;;  %s4843_s28 = smov (!%p296_p3, %s2713_s28), 1  ;;  %vm353_vm0 = vcmask 523264   ;;  %vm723_vm1 = vcmask 261120  }
   0xc   : > { %3040 = vmatprep.subr.mxu0 %v345_v0  ;;  %v342_v3 = vld [vmem:[%s4834_s1 + $0x20] sm:$0xff]  ;;  %s2864_s15 = sshll.u32 %s4843_s28, 8  ;;  %v341_v4 = vld [vmem:[%s4834_s1 + $0x18] sm:$0xff]  ;;  %v340_v6 = vld [vmem:[%s4834_s1 + $0x10] sm:$0xff]  ;;  %vm3511_vm2 = vmmov 0  }
   0xd   : > { %3041 = vmatpush3.msra.mxu0 %v345_v0  ;;  %s3585_s18 = scalar_lea.vmem %s4833_s0, %s2864_s15  ;;  %v339_v7 = vld [vmem:[%s4834_s1 + $0x8] sm:$0xff]  ;;  %v338_v8 = vld [vmem:[%s4834_s1] sm:$0xff]  ;;  %s4712_s29 = scalar_lea.vmem %s4841_s8, %s2864_s15 }
   0xe   : > { %3042 = vmatprep.subr.mxu0 %v344_v1  ;;  %v306_v5 = vld [vmem:[%s3585_s18] sm:$0xff]  ;;  %v307_v9 = vld [vmem:[%s3585_s18 + $0x8] sm:$0xff]  ;;  %v308_v10 = vld [vmem:[%s3585_s18 + $0x10] sm:$0xff] }
   0xf   : > { %3043 = vmatpush3.msra.mxu0 %v344_v1  ;;  %3056 = vmatprep.mubr.msk.f32.mxu0 %vm353_vm0, %v306_v5  ;;  %v309_v11 = vld [vmem:[%s3585_s18 + $0x18] sm:$0xff]  ;;  %v310_v12 = vld [vmem:[%s3585_s18 + $0x20] sm:$0xff]  ;;  %v311_v13 = vld [vmem:[%s3585_s18 + $0x28] sm:$0xff] }
  0x10   : > { %3044 = vmatprep.subr.mxu0 %v343_v2  ;;  %v312_v14 = vld [vmem:[%s3585_s18 + $0x30] sm:$0xff]  ;;  %v313_v15 = vld [vmem:[%s3585_s18 + $0x38] sm:$0xff]  ;;  %v314_v16 = vld [vmem:[%s3585_s18 + $0x40] sm:$0xff] }
  0x11   : > { %3045 = vmatpush3.msra.mxu0 %v343_v2  ;;  %v315_v17 = vld [vmem:[%s3585_s18 + $0x48] sm:$0xff]  ;;  %v316_v18 = vld [vmem:[%s3585_s18 + $0x50] sm:$0xff]  ;;  %v317_v19 = vld [vmem:[%s3585_s18 + $0x58] sm:$0xff] }
  0x12   : > { %3046 = vmatprep.subr.mxu0 %v342_v3  ;;  %v318_v20 = vld [vmem:[%s3585_s18 + $0x60] sm:$0xff]  ;;  %v319_v21 = vld [vmem:[%s3585_s18 + $0x68] sm:$0xff]  ;;  %v320_v22 = vld [vmem:[%s3585_s18 + $0x70] sm:$0xff] }
  0x13   : > { %3047 = vmatpush3.msra.mxu0 %v342_v3  ;;  %v321_v23 = vld [vmem:[%s3585_s18 + $0x78] sm:$0xff]  ;;  %v322_v24 = vld [vmem:[%s3585_s18 + $0x80] sm:$0xff]  ;;  %v323_v25 = vld [vmem:[%s3585_s18 + $0x88] sm:$0xff] }
  0x14   : > { %3048 = vmatprep.subr.mxu0 %v341_v4  ;;  %v324_v26 = vld [vmem:[%s3585_s18 + $0x90] sm:$0xff]  ;;  %v325_v27 = vld [vmem:[%s3585_s18 + $0x98] sm:$0xff]  ;;  %v326_v28 = vld [vmem:[%s3585_s18 + $0xa0] sm:$0xff] }
  0x15   : > { %3049 = vmatpush3.msra.mxu0 %v341_v4  ;;  %v327_v29 = vld [vmem:[%s3585_s18 + $0xa8] sm:$0xff]  ;;  %v328_v30 = vld [vmem:[%s3585_s18 + $0xb0] sm:$0xff]  ;;  %v329_v31 = vld [vmem:[%s3585_s18 + $0xb8] sm:$0xff] }
  0x16   : > { %3050 = vmatprep.subr.mxu0 %v340_v6  ;;  %v330_v32 = vld [vmem:[%s3585_s18 + $0xc0] sm:$0xff]  ;;  %v331_v33 = vld [vmem:[%s3585_s18 + $0xc8] sm:$0xff]  ;;  %v332_v34 = vld [vmem:[%s3585_s18 + $0xd0] sm:$0xff] }
  0x17   : > { %3051 = vmatpush3.msra.mxu0 %v340_v6  ;;  %v333_v35 = vld [vmem:[%s3585_s18 + $0xd8] sm:$0xff]  ;;  %v334_v36 = vld [vmem:[%s3585_s18 + $0xe0] sm:$0xff]  ;;  %v335_v37 = vld [vmem:[%s3585_s18 + $0xe8] sm:$0xff] }
  0x18   : > { %3052 = vmatprep.subr.mxu0 %v339_v7  ;;  %v336_v38 = vld [vmem:[%s3585_s18 + $0xf0] sm:$0xff]  ;;  %v337_v39 = vld [vmem:[%s3585_s18 + $0xf8] sm:$0xff]  ;;  %v3666_v40 = vld [vmem:[%s4835_s2] ss:$0 sm:$0xff] }
  0x19   : > { %3053 = vmatpush3.msra.mxu0 %v339_v7 }
  0x1a   : > { %3054 = vmatprep.subr.mxu0 %v338_v8 }
  0x1b   : > { %3055 = vmatpush3.msra.mxu0 %v338_v8 }
  0x1c   : > { %3057 = vmatmul.mubr.msk.f32.vlgmr.msra.gmra.mxu0 %vm353_vm0, %v307_v9 }
  0x1d   : > { %3059 = vmatprep.mubr.msk.f32.mxu0 %vm353_vm0, %v308_v10 }
  0x20   : > { %3060 = vmatmul.mubr.msk.f32.gmra.mxu0 %vm353_vm0, %v309_v11 }
  0x21   : > { %3062 = vmatprep.mubr.msk.f32.mxu0 %vm353_vm0, %v310_v12 }
  0x24   : > { %3063 = vmatmul.mubr.msk.f32.gmra.mxu0 %vm353_vm0, %v311_v13 }
  0x25   : > { %3065 = vmatprep.mubr.msk.f32.mxu0 %vm353_vm0, %v312_v14 }
  0x28   : > { %3066 = vmatmul.mubr.msk.f32.gmra.mxu0 %vm353_vm0, %v313_v15 }
  0x29   : > { %3068 = vmatprep.mubr.msk.f32.mxu0 %vm353_vm0, %v314_v16 }
  0x2c   : > { %3069 = vmatmul.mubr.msk.f32.gmra.mxu0 %vm353_vm0, %v315_v17 }
  0x2d   : > { %3071 = vmatprep.mubr.msk.f32.mxu0 %vm353_vm0, %v316_v18 }
  0x30   : > { %3072 = vmatmul.mubr.msk.f32.gmra.mxu0 %vm353_vm0, %v317_v19 }
  0x31   : > { %3074 = vmatprep.mubr.msk.f32.mxu0 %vm353_vm0, %v318_v20 }
  0x34   : > { %3075 = vmatmul.mubr.msk.f32.gmra.mxu0 %vm353_vm0, %v319_v21 }
  0x35   : > { %3077 = vmatprep.mubr.msk.f32.mxu0 %vm353_vm0, %v320_v22 }
  0x38   : > { %3078 = vmatmul.mubr.msk.f32.gmra.mxu0 %vm353_vm0, %v321_v23 }
  0x39   : > { %3080 = vmatprep.mubr.msk.f32.mxu0 %vm353_vm0, %v322_v24 }
  0x3c   : > { %3081 = vmatmul.mubr.msk.f32.gmra.mxu0 %vm353_vm0, %v323_v25 }
  0x3d   : > { %3083 = vmatprep.mubr.msk.f32.mxu0 %vm353_vm0, %v324_v26 }
  0x40   : > { %3084 = vmatmul.mubr.msk.f32.gmra.mxu0 %vm353_vm0, %v325_v27 }
  0x41   : > { %3086 = vmatprep.mubr.msk.f32.mxu0 %vm353_vm0, %v326_v28 }
  0x44   : > { %3087 = vmatmul.mubr.msk.f32.gmra.mxu0 %vm353_vm0, %v327_v29 }
  0x45   : > { %3089 = vmatprep.mubr.msk.f32.mxu0 %vm353_vm0, %v328_v30 }
  0x48   : > { %3090 = vmatmul.mubr.msk.f32.gmra.mxu0 %vm353_vm0, %v329_v31 }
  0x49   : > { %3092 = vmatprep.mubr.msk.f32.mxu0 %vm353_vm0, %v330_v32 }
  0x4c   : > { %3093 = vmatmul.mubr.msk.f32.gmra.mxu0 %vm353_vm0, %v331_v33 }
  0x4d   : > { %3095 = vmatprep.mubr.msk.f32.mxu0 %vm353_vm0, %v332_v34 }
  0x50   : > { %3096 = vmatmul.mubr.msk.f32.gmra.mxu0 %vm353_vm0, %v333_v35 }
  0x51   : > { %3098 = vmatprep.mubr.msk.f32.mxu0 %vm353_vm0, %v334_v36 }
  0x54   : > { %3099 = vmatmul.mubr.msk.f32.gmra.mxu0 %vm353_vm0, %v335_v37 }
  0x55   : > { %3101 = vmatprep.mubr.msk.f32.mxu0 %vm353_vm0, %v336_v38 }
  0x58   : > { %3102 = vmatmul.mubr.msk.f32.gmra.mxu0 %vm353_vm0, %v337_v39 }
  0xdc   : > { %v3058_v41 = vpop.f32.mrf.mxu0 }
  0xdd   : > { %v3669_v42 = vadd.f32 %v3058_v41, %v3666_v40 }
  0xde   : > { %v516_v43 = vpop.f32.mrf.mxu0 }
  0xdf   : > { %v3672_v44 = vadd.f32 %v3666_v40, %v516_v43 }
  0xe0   : > { %v3061_v45 = vpop.f32.mrf.mxu0 }
  0xe1   : > { %v3675_v46 = vadd.f32 %v3061_v45, %v3666_v40  ;;  %3120 = vmatprep.mubr.msk.f32.mxu1 %vm723_vm1, %v3672_v44 }
  0xe2   : > { %v526_v47 = vpop.f32.mrf.mxu0 }
  0xe3   : > { %v3751_v37 = vadd.f32 %v3666_v40, %v526_v47 }
  0xe4   : > { %v3064_v48 = vpop.f32.mrf.mxu0 }
  0xe5   : > { %v3687_v10 = vadd.f32 %v3064_v48, %v3666_v40 }
  0xe6   : > { %v536_v49 = vpop.f32.mrf.mxu0 }
  0xe7   : > { %v3712_v20 = vadd.f32 %v3666_v40, %v536_v49 }
  0xe8   : > { %v3067_v50 = vpop.f32.mrf.mxu0 }
  0xe9   : > { %v3715_v21 = vadd.f32 %v3067_v50, %v3666_v40 }
  0xea   : > { %v546_v51 = vpop.f32.mrf.mxu0 }
  0xeb   : > { %v3754_v38 = vadd.f32 %v3666_v40, %v546_v51 }
  0xec   : > { %v3679_v52 = vpop.f32.mrf.mxu0 }
  0xee   : > { %v556_v53 = vpop.f32.mrf.mxu0 }
  0xef   : > { %v3767_v47 = vadd.f32 %v3666_v40, %v556_v53 }
  0xf0   : > { %v3073_v54 = vpop.f32.mrf.mxu0 }
  0xf1   : > { %v3770_v50 = vadd.f32 %v3073_v54, %v3666_v40 }
  0xf2   : > { %v566_v55 = vpop.f32.mrf.mxu0 }
  0xf3   : > { %v3729_v28 = vadd.f32 %v3666_v40, %v566_v55 }
  0xf4   : > { %v3076_v56 = vpop.f32.mrf.mxu0 }
  0xf5   : > { %v3684_v8 = vadd.f32 %v3076_v56, %v3666_v40  ;;  %v677_v51 = vmax.f32 %v3751_v37, %v3729_v28 }
  0xf6   : > { %v576_v57 = vpop.f32.mrf.mxu0 }
  0xf7   : > { %v3696_v13 = vadd.f32 %v3666_v40, %v576_v57  ;;  %v680_v16 = vmax.f32 %v3687_v10, %v3684_v8 }
  0xf8   : > { %v3079_v58 = vpop.f32.mrf.mxu0 }
  0xf9   : > { %v3699_v14 = vadd.f32 %v3079_v58, %v3666_v40  ;;  %v679_v29 = vmax.f32 %v3712_v20, %v3696_v13 }
  0xfa   : > { %v586_v59 = vpop.f32.mrf.mxu0 }
  0xfb   : > { %v682_v30 = vmax.f32 %v3715_v21, %v3699_v14  ;;  %v3736_v31 = vadd.f32 %v3666_v40, %v586_v59 }
  0xfc   : > { %v3681_v60 = vpop.f32.mrf.mxu0 }
  0xfd   : > { %v681_v55 = vmax.f32 %v3754_v38, %v3736_v31 }
  0xfe   : > { %v596_v61 = vpop.f32.mrf.mxu0 }
  0xff   : > { %v3777_v56 = vadd.f32 %v3666_v40, %v596_v61  ;;  %v3793_v61 = vadd.f32 %v3679_v52, %v3666_v40 }
 0x100   : > { %v3085_v62 = vpop.f32.mrf.mxu0 }
 0x101   : > { %v3780_v57 = vadd.f32 %v3085_v62, %v3666_v40  ;;  %v675_v62 = vmax.f32 %v3672_v44, %v3767_v47  ;;  %v676_v44 = vmax.f32 %v3669_v42, %v3793_v61 }
 0x102   : > { %v606_v63 = vpop.f32.mrf.mxu0 }
 0x103   : > { %v3739_v33 = vadd.f32 %v3666_v40, %v606_v63 }
 0x104   : > { %v3088_v0 = vpop.f32.mrf.mxu0 }
 0x105   : > { %v3690_v11 = vadd.f32 %v3088_v0, %v3666_v40  ;;  %v678_v0 = vmax.f32 %v3675_v46, %v3770_v50 }
 0x106   : > { %v616_v1 = vpop.f32.mrf.mxu0 }
 0x107   : > { %v3704_v17 = vadd.f32 %v3666_v40, %v616_v1  ;;  %v3801_v1 = vadd.f32 %v3681_v60, %v3666_v40 }
 0x108   : > { %v3091_v2 = vpop.f32.mrf.mxu0 }
 0x109   : > { %v3718_v22 = vadd.f32 %v3091_v2, %v3666_v40 }
 0x10a   : > { %v626_v3 = vpop.f32.mrf.mxu0 }
 0x10b   : > { %v3742_v34 = vadd.f32 %v3666_v40, %v626_v3 }
 0x10c   : > { %v3094_v4 = vpop.f32.mrf.mxu0 }
 0x10d   : > { %v3785_v53 = vadd.f32 %v3094_v4, %v3666_v40 }
 0x10e   : > { %v636_v5 = vpop.f32.mrf.mxu0 }
 0x10f   : > { %v3757_v39 = vadd.f32 %v3666_v40, %v636_v5  ;;  %v684_v2 = vmax.f32 %v3801_v1, %v3785_v53 }
 0x110   : > { %v3097_v6 = vpop.f32.mrf.mxu0 }
 0x111   : > { %v3760_v41 = vadd.f32 %v3097_v6, %v3666_v40  ;;  %v683_v54 = vmax.f32 %v3777_v56, %v3757_v39 }
 0x112   : > { %v646_v7 = vpop.f32.mrf.mxu0 }
 0x113   : > { %v3721_v24 = vadd.f32 %v3666_v40, %v646_v7  ;;  %v686_v58 = vmax.f32 %v3780_v57, %v3760_v41  ;;  %v3807_v52 = vmax.f32 %v675_v62, %v683_v54 }
 0x114   : > { %v3100_v9 = vpop.f32.mrf.mxu0 }
 0x115   : > { %v3693_v12 = vadd.f32 %v3100_v9, %v3666_v40  ;;  %v685_v43 = vmax.f32 %v3739_v33, %v3721_v24  ;;  %v694_v3 = vmax.f32 %v678_v0, %v686_v58 }
 0x116   : > { %v656_v15 = vpop.f32.mrf.mxu0 }
 0x117   : > { %v688_v18 = vmax.f32 %v3690_v11, %v3693_v12  ;;  %v3709_v19 = vadd.f32 %v3666_v40, %v656_v15  ;;  %v693_v63 = vmax.f32 %v677_v51, %v685_v43 }
 0x118   : > { %v3103_v23 = vpop.f32.mrf.mxu0 }
 0x119   : > { %v687_v25 = vmax.f32 %v3704_v17, %v3709_v19  ;;  %v3726_v26 = vadd.f32 %v3103_v23, %v3666_v40  ;;  %v696_v27 = vmax.f32 %v680_v16, %v688_v18 }
 0x11a   : > { %v666_v32 = vpop.f32.mrf.mxu0 }
 0x11b   : > { %v690_v35 = vmax.f32 %v3718_v22, %v3726_v26  ;;  %v3747_v36 = vadd.f32 %v3666_v40, %v666_v32  ;;  %717 = vrot.lane.b32.xlu1 %v696_v27, %s3508_s9  ;;  %v695_v49 = vmax.f32 %v679_v29, %v687_v25  ;;  %v3814_v40 = vmax.f32 %v676_v44, %v684_v2 }
 0x11d   : > { %v689_v45 = vmax.f32 %v3742_v34, %v3747_v36  ;;  %v698_v48 = vmax.f32 %v682_v30, %v690_v35 }
 0x11f   : > { %721 = vrot.lane.b32.xlu0 %v698_v48, %s3508_s9  ;;  %715 = vrot.lane.b32.xlu1 %v695_v49, %s3508_s9  ;;  %v697_v59 = vmax.f32 %v681_v55, %v689_v45 }
 0x123   : > { %719 = vrot.lane.b32.xlu0 %v697_v59, %s3508_s9  ;;  %711 = vrot.lane.b32.xlu1 %v693_v63, %s3508_s9 }
 0x127   : > { %713 = vrot.lane.b32.xlu0 %v694_v3, %s3508_s9  ;;  %707 = vrot.lane.b32.xlu1 %v3807_v52, %s3508_s9 }
 0x12b   : > { %709 = vrot.lane.b32.xlu0 %v3814_v40, %s3508_s9  ;;  %1523 = vrot.lane.b32.xlu1 %v698_v48, %s3509_s10 }
 0x12f   : > { %1515 = vrot.lane.b32.xlu0 %v694_v3, %s3509_s10  ;;  %1519 = vrot.lane.b32.xlu1 %v696_v27, %s3509_s10 }
 0x133   : > { %1521 = vrot.lane.b32.xlu0 %v697_v59, %s3509_s10  ;;  %1517 = vrot.lane.b32.xlu1 %v695_v49, %s3509_s10 }
 0x137   : > { %1513 = vrot.lane.b32.xlu1 %v693_v63, %s3509_s10 }
 0x18d   : > { %v718_v60 = vpop.permute.xlu1 %717 }
 0x191   : > { %v722_v4 = vpop.permute.xlu0 %721  ;;  %v716_v5 = vpop.permute.xlu1 %715 }
 0x192   : > { %3104 = vmatprep.subr.msk.mxu1 %vm723_vm1, %v722_v4 }
 0x193   : > { %3105 = vmatpush3.xpose.msk.msra.mxu1 %vm723_vm1, %v722_v4 }
 0x195   : > { %v720_v6 = vpop.permute.xlu0 %719  ;;  %v712_v7 = vpop.permute.xlu1 %711 }
 0x196   : > { %3106 = vmatprep.subr.msk.mxu1 %vm723_vm1, %v720_v6 }
 0x197   : > { %3107 = vmatpush3.xpose.msk.msra.mxu1 %vm723_vm1, %v720_v6 }
 0x198   : > { %3108 = vmatprep.subr.msk.mxu1 %vm723_vm1, %v718_v60 }
 0x199   : > { %v714_v9 = vpop.permute.xlu0 %713  ;;  %v708_v15 = vpop.permute.xlu1 %707 }
 0x19b   : > { %3109 = vmatpush3.xpose.msk.msra.mxu1 %vm723_vm1, %v718_v60 }
 0x19c   : > { %3110 = vmatprep.subr.msk.mxu1 %vm723_vm1, %v716_v5 }
 0x19d   : > { %v710_v16 = vpop.permute.xlu0 %709  ;;  %v1524_v18 = vpop.permute.xlu1 %1523 }
 0x19e   : > { %3168 = vmatprep.subr.mxu0 %v1524_v18 }
 0x19f   : > { %3111 = vmatpush3.xpose.msk.msra.mxu1 %vm723_vm1, %v716_v5  ;;  %3169 = vmatpush3.msra.mxu0 %v1524_v18 }
 0x1a0   : > { %3112 = vmatprep.subr.msk.mxu1 %vm723_vm1, %v714_v9 }
 0x1a1   : > { %v1516_v23 = vpop.permute.xlu0 %1515  ;;  %v1520_v25 = vpop.permute.xlu1 %1519 }
 0x1a3   : > { %3113 = vmatpush3.xpose.msk.msra.mxu1 %vm723_vm1, %v714_v9 }
 0x1a4   : > { %3114 = vmatprep.subr.msk.mxu1 %vm723_vm1, %v712_v7 }
 0x1a5   : > { %v1522_v27 = vpop.permute.xlu0 %1521  ;;  %v1518_v29 = vpop.permute.xlu1 %1517 }
 0x1a6   : > { %3170 = vmatprep.subr.mxu0 %v1522_v27 }
 0x1a7   : > { %3115 = vmatpush3.xpose.msk.msra.mxu1 %vm723_vm1, %v712_v7  ;;  %3171 = vmatpush3.msra.mxu0 %v1522_v27 }
 0x1a8   : > { %3116 = vmatprep.subr.msk.mxu1 %vm723_vm1, %v710_v16  ;;  %3172 = vmatprep.subr.mxu0 %v1520_v25 }
 0x1a9   : > { %3173 = vmatpush3.msra.mxu0 %v1520_v25  ;;  %v1514_v30 = vpop.permute.xlu1 %1513 }
 0x1aa   : > { %3174 = vmatprep.subr.mxu0 %v1518_v29 }
 0x1ab   : > { %3117 = vmatpush3.xpose.msk.msra.mxu1 %vm723_vm1, %v710_v16  ;;  %3175 = vmatpush3.msra.mxu0 %v1518_v29 }
 0x1ac   : > { %3118 = vmatprep.subr.msk.mxu1 %vm723_vm1, %v708_v15  ;;  %3176 = vmatprep.subr.mxu0 %v1516_v23 }
 0x1ad   : > { %3177 = vmatpush3.msra.mxu0 %v1516_v23 }
 0x1ae   : > { %3178 = vmatprep.subr.mxu0 %v1514_v30 }
 0x1af   : > { %3119 = vmatpush3.xpose.msk.msra.mxu1 %vm723_vm1, %v708_v15  ;;  %3179 = vmatpush3.msra.mxu0 %v1514_v30 }
 0x1b2   : > { %3121 = vmatmul.mubr.msk.f32.vlgmr.msra.gmra.mxu1 %vm723_vm1, %v3669_v42 }
 0x1b3   : > { %3123 = vmatprep.mubr.msk.f32.mxu1 %vm723_vm1, %v3751_v37 }
 0x1b6   : > { %3124 = vmatmul.mubr.msk.f32.gmra.mxu1 %vm723_vm1, %v3675_v46 }
 0x1b7   : > { %3126 = vmatprep.mubr.msk.f32.mxu1 %vm723_vm1, %v3712_v20 }
 0x1ba   : > { %3127 = vmatmul.mubr.msk.f32.gmra.mxu1 %vm723_vm1, %v3687_v10 }
 0x1bb   : > { %3129 = vmatprep.mubr.msk.f32.mxu1 %vm723_vm1, %v3754_v38 }
 0x1be   : > { %3130 = vmatmul.mubr.msk.f32.gmra.mxu1 %vm723_vm1, %v3715_v21 }
 0x1bf   : > { %3132 = vmatprep.mubr.msk.f32.mxu1 %vm723_vm1, %v3767_v47 }
 0x1c2   : > { %3133 = vmatmul.mubr.msk.f32.gmra.mxu1 %vm723_vm1, %v3793_v61 }
 0x1c3   : > { %3135 = vmatprep.mubr.msk.f32.mxu1 %vm723_vm1, %v3729_v28 }
 0x1c6   : > { %3136 = vmatmul.mubr.msk.f32.gmra.mxu1 %vm723_vm1, %v3770_v50 }
 0x1c7   : > { %3138 = vmatprep.mubr.msk.f32.mxu1 %vm723_vm1, %v3696_v13 }
 0x1ca   : > { %3139 = vmatmul.mubr.msk.f32.gmra.mxu1 %vm723_vm1, %v3684_v8 }
 0x1cb   : > { %3141 = vmatprep.mubr.msk.f32.mxu1 %vm723_vm1, %v3736_v31 }
 0x1ce   : > { %3142 = vmatmul.mubr.msk.f32.gmra.mxu1 %vm723_vm1, %v3699_v14 }
 0x1cf   : > { %3144 = vmatprep.mubr.msk.f32.mxu1 %vm723_vm1, %v3777_v56 }
 0x1d2   : > { %3145 = vmatmul.mubr.msk.f32.gmra.mxu1 %vm723_vm1, %v3801_v1 }
 0x1d3   : > { %3147 = vmatprep.mubr.msk.f32.mxu1 %vm723_vm1, %v3739_v33 }
 0x1d6   : > { %3148 = vmatmul.mubr.msk.f32.gmra.mxu1 %vm723_vm1, %v3780_v57 }
 0x1d7   : > { %3150 = vmatprep.mubr.msk.f32.mxu1 %vm723_vm1, %v3704_v17 }
 0x1da   : > { %3151 = vmatmul.mubr.msk.f32.gmra.mxu1 %vm723_vm1, %v3690_v11 }
 0x1db   : > { %3153 = vmatprep.mubr.msk.f32.mxu1 %vm723_vm1, %v3742_v34 }
 0x1de   : > { %3154 = vmatmul.mubr.msk.f32.gmra.mxu1 %vm723_vm1, %v3718_v22 }
 0x1df   : > { %3156 = vmatprep.mubr.msk.f32.mxu1 %vm723_vm1, %v3757_v39 }
 0x1e2   : > { %3157 = vmatmul.mubr.msk.f32.gmra.mxu1 %vm723_vm1, %v3785_v53 }
 0x1e3   : > { %3159 = vmatprep.mubr.msk.f32.mxu1 %vm723_vm1, %v3721_v24 }
 0x1e6   : > { %3160 = vmatmul.mubr.msk.f32.gmra.mxu1 %vm723_vm1, %v3760_v41 }
 0x1e7   : > { %3162 = vmatprep.mubr.msk.f32.mxu1 %vm723_vm1, %v3709_v19 }
 0x1ea   : > { %3163 = vmatmul.mubr.msk.f32.gmra.mxu1 %vm723_vm1, %v3693_v12 }
 0x1eb   : > { %3165 = vmatprep.mubr.msk.f32.mxu1 %vm723_vm1, %v3747_v36 }
 0x1ee   : > { %3166 = vmatmul.mubr.msk.f32.gmra.mxu1 %vm723_vm1, %v3726_v26 }
 0x272   : > { %v3902_v42 = vpop.f32.mrf.mxu1 }
 0x273   : > { %v1064_v46 = vsel %vm353_vm0, %v3902_v42, -inf }
 0x274   : > { %1065 = vmax.xlane.f32.xlu1 %v1064_v46  ;;  %v3906_v8 = vpop.f32.mrf.mxu1 }
 0x275   : > { %v1061_v10 = vsel %vm353_vm0, %v3906_v8, -inf }
 0x276   : > { %1062 = vmax.xlane.f32.xlu0 %v1061_v10  ;;  %v3910_v11 = vpop.f32.mrf.mxu1 }
 0x277   : > { %v1070_v13 = vsel %vm353_vm0, %v3910_v11, -inf }
 0x278   : > { %v3912_v12 = vpop.f32.mrf.mxu1 }
 0x279   : > { %v1067_v19 = vsel %vm353_vm0, %v3912_v12, -inf }
 0x27a   : > { %1071 = vmax.xlane.f32.xlu0 %v1070_v13  ;;  %v3916_v14 = vpop.f32.mrf.mxu1 }
 0x27b   : > { %v1076_v4 = vsel %vm353_vm0, %v3916_v14, -inf }
 0x27c   : > { %v3918_v17 = vpop.f32.mrf.mxu1 }
 0x27d   : > { %v1073_v20 = vsel %vm353_vm0, %v3918_v17, -inf }
 0x27e   : > { %1068 = vmax.xlane.f32.xlu0 %v1067_v19  ;;  %1074 = vmax.xlane.f32.xlu1 %v1073_v20  ;;  %v3924_v21 = vpop.f32.mrf.mxu1 }
 0x27f   : > { %v1082_v5 = vsel %vm353_vm0, %v3924_v21, -inf }
 0x280   : > { %v3926_v22 = vpop.f32.mrf.mxu1 }
 0x281   : > { %v1079_v24 = vsel %vm353_vm0, %v3926_v22, -inf }
 0x282   : > { %1080 = vmax.xlane.f32.xlu1 %v1079_v24  ;;  %v3930_v26 = vpop.f32.mrf.mxu1 }
 0x283   : > { %v1088_v6 = vsel %vm353_vm0, %v3930_v26, -inf }
 0x284   : > { %v3932_v28 = vpop.f32.mrf.mxu1 }
 0x285   : > { %v1085_v31 = vsel %vm353_vm0, %v3932_v28, -inf }
 0x286   : > { %1086 = vmax.xlane.f32.xlu1 %v1085_v31  ;;  %v3936_v32 = vpop.f32.mrf.mxu1 }
 0x287   : > { %v1094_v7 = vsel %vm353_vm0, %v3936_v32, -inf }
 0x288   : > { %v3938_v33 = vpop.f32.mrf.mxu1 }
 0x289   : > { %v1091_v34 = vsel %vm353_vm0, %v3938_v33, -inf }
 0x28a   : > { %1092 = vmax.xlane.f32.xlu1 %v1091_v34  ;;  %v3942_v35 = vpop.f32.mrf.mxu1 }
 0x28b   : > { %v1100_v9 = vsel %vm353_vm0, %v3942_v35, -inf }
 0x28c   : > { %v3944_v36 = vpop.f32.mrf.mxu1 }
 0x28d   : > { %v1097_v37 = vsel %vm353_vm0, %v3944_v36, -inf }
 0x28e   : > { %1098 = vmax.xlane.f32.xlu1 %v1097_v37  ;;  %v3948_v38 = vpop.f32.mrf.mxu1 }
 0x28f   : > { %v1106_v15 = vsel %vm353_vm0, %v3948_v38, -inf }
 0x290   : > { %v3950_v39 = vpop.f32.mrf.mxu1 }
 0x291   : > { %v1103_v41 = vsel %vm353_vm0, %v3950_v39, -inf }
 0x292   : > { %1104 = vmax.xlane.f32.xlu1 %v1103_v41  ;;  %v3954_v43 = vpop.f32.mrf.mxu1 }
 0x293   : > { %v1112_v16 = vsel %vm353_vm0, %v3954_v43, -inf }
 0x294   : > { %1511 = vrot.lane.b32.xlu0 %v3814_v40, %s3509_s10  ;;  %v3958_v45 = vpop.f32.mrf.mxu1 }
 0x295   : > { %v1109_v48 = vsel %vm353_vm0, %v3958_v45, -inf }
 0x296   : > { %1110 = vmax.xlane.f32.xlu1 %v1109_v48  ;;  %v3962_v49 = vpop.f32.mrf.mxu1 }
 0x297   : > { %v1118_v18 = vsel %vm353_vm0, %v3962_v49, -inf }
 0x298   : > { %v3964_v47 = vpop.f32.mrf.mxu1 }
 0x299   : > { %v1115_v50 = vsel %vm353_vm0, %v3964_v47, -inf }
 0x29a   : > { %1116 = vmax.xlane.f32.xlu1 %v1115_v50  ;;  %v3968_v51 = vpop.f32.mrf.mxu1 }
 0x29b   : > { %v1124_v23 = vsel %vm353_vm0, %v3968_v51, -inf }
 0x29c   : > { %v3970_v55 = vpop.f32.mrf.mxu1 }
 0x29d   : > { %v1121_v56 = vsel %vm353_vm0, %v3970_v55, -inf }
 0x29e   : > { %1122 = vmax.xlane.f32.xlu1 %v1121_v56  ;;  %v3974_v57 = vpop.f32.mrf.mxu1 }
 0x29f   : > { %v1130_v25 = vsel %vm353_vm0, %v3974_v57, -inf }
 0x2a0   : > { %v3976_v53 = vpop.f32.mrf.mxu1 }
 0x2a1   : > { %v1127_v54 = vsel %vm353_vm0, %v3976_v53, -inf }
 0x2a2   : > { %1128 = vmax.xlane.f32.xlu1 %v1127_v54  ;;  %v3980_v58 = vpop.f32.mrf.mxu1 }
 0x2a3   : > { %v1136_v27 = vsel %vm353_vm0, %v3980_v58, -inf }
 0x2a4   : > { %v3982_v59 = vpop.f32.mrf.mxu1 }
 0x2a5   : > { %v1133_v63 = vsel %vm353_vm0, %v3982_v59, -inf }
 0x2a6   : > { %1134 = vmax.xlane.f32.xlu1 %v1133_v63  ;;  %v3986_v61 = vpop.f32.mrf.mxu1 }
 0x2a7   : > { %v1142_v29 = vsel %vm353_vm0, %v3986_v61, -inf }
 0x2a8   : > { %v3988_v62 = vpop.f32.mrf.mxu1 }
 0x2a9   : > { %v1139_v0 = vsel %vm353_vm0, %v3988_v62, -inf }
 0x2aa   : > { %1140 = vmax.xlane.f32.xlu1 %v1139_v0  ;;  %v3992_v1 = vpop.f32.mrf.mxu1 }
 0x2ab   : > { %v1148_v30 = vsel %vm353_vm0, %v3992_v1, -inf }
 0x2ac   : > { %v3994_v2 = vpop.f32.mrf.mxu1 }
 0x2ad   : > { %v1145_v3 = vsel %vm353_vm0, %v3994_v2, -inf }
 0x2ae   : > { %1146 = vmax.xlane.f32.xlu1 %v1145_v3  ;;  %v3998_v44 = vpop.f32.mrf.mxu1 }
 0x2af   : > { %v1154_v46 = vsel %vm353_vm0, %v3998_v44, -inf }
 0x2b0   : > { %v4000_v40 = vpop.f32.mrf.mxu1 }
 0x2b1   : > { %v1151_v60 = vsel %vm353_vm0, %v4000_v40, -inf }
 0x2b2   : > { %1152 = vmax.xlane.f32.xlu1 %v1151_v60 }
 0x2b3   : > { %1077 = vmax.xlane.f32.xlu0 %v1076_v4 }
 0x2b7   : > { %1083 = vmax.xlane.f32.xlu0 %v1082_v5 }
 0x2bb   : > { %1089 = vmax.xlane.f32.xlu0 %v1088_v6 }
 0x2bf   : > { %1095 = vmax.xlane.f32.xlu0 %v1094_v7 }
 0x2c3   : > { %1101 = vmax.xlane.f32.xlu0 %v1100_v9 }
 0x2c7   : > { %1107 = vmax.xlane.f32.xlu0 %v1106_v15 }
 0x2cb   : > { %1113 = vmax.xlane.f32.xlu0 %v1112_v16 }
 0x2cf   : > { %1119 = vmax.xlane.f32.xlu0 %v1118_v18 }
 0x2d3   : > { %1125 = vmax.xlane.f32.xlu0 %v1124_v23 }
 0x2d7   : > { %1131 = vmax.xlane.f32.xlu0 %v1130_v25 }
 0x2db   : > { %1137 = vmax.xlane.f32.xlu0 %v1136_v27 }
 0x2df   : > { %1143 = vmax.xlane.f32.xlu0 %v1142_v29 }
 0x2e3   : > { %1149 = vmax.xlane.f32.xlu0 %v1148_v30 }
 0x2e7   : > { %1155 = vmax.xlane.f32.xlu0 %v1154_v46 }
 0x2fd   : > { %v1066_v10 = vpop.xlane.xlu1 %1065 }
 0x2fe   : > { %v1158_v13 = vsub.f32 %v3902_v42, %v1066_v10 }
 0x2ff   : > { %v1063_v19 = vpop.xlane.xlu0 %1062 }
 0x300   : > { %v1191_v20 = vmul.f32 1.442695, %v1158_v13  ;;  %v1157_v24 = vsub.f32 %v3906_v8, %v1063_v19 }
 0x302   : > { %3338 = vpow2.f32 %v1191_v20  ;;  %v1189_v31 = vmul.f32 1.442695, %v1157_v24 }
 0x303   : > { %v1072_v34 = vpop.xlane.xlu0 %1071 }
 0x304   : > { %3340 = vpow2.f32 %v1189_v31  ;;  %v1160_v37 = vsub.f32 %v3910_v11, %v1072_v34 }
 0x306   : > { %v1195_v41 = vmul.f32 1.442695, %v1160_v37 }
 0x307   : > { %v1069_v48 = vpop.xlane.xlu0 %1068  ;;  %v1075_v50 = vpop.xlane.xlu1 %1074 }
 0x308   : > { %3342 = vpow2.f32 %v1195_v41  ;;  %v1159_v56 = vsub.f32 %v3912_v12, %v1069_v48  ;;  %v1161_v54 = vsub.f32 %v3918_v17, %v1075_v50 }
 0x30a   : > { %v1193_v63 = vmul.f32 1.442695, %v1159_v56  ;;  %v1197_v42 = vmul.f32 1.442695, %v1161_v54 }
 0x30b   : > { %v1512_v0 = vpop.permute.xlu0 %1511  ;;  %v1081_v3 = vpop.xlane.xlu1 %1080 }
 0x30c   : > { %3344 = vpow2.f32 %v1193_v63  ;;  %v1163_v8 = vsub.f32 %v3926_v22, %v1081_v3  ;;  %3180 = vmatprep.subr.mxu0 %v1512_v0 }
 0x30d   : > { %3181 = vmatpush3.msra.mxu0 %v1512_v0  ;;  %3346 = vpow2.f32 %v1197_v42 }
 0x30e   : > { %v1201_v60 = vmul.f32 1.442695, %v1163_v8 }
 0x30f   : > { %v4038_v11 = vpop.eup %3338  ;;  %v1087_v4 = vpop.xlane.xlu1 %1086 }
 0x310   : > { %v1165_v5 = vsub.f32 %v3932_v28, %v1087_v4  ;;  %v1256_v12 = vsel %vm353_vm0, %v4038_v11, 0.0  ;;  %3348 = vpow2.f32 %v1201_v60 }
 0x311   : > { %v4043_v17 = vpop.eup %3340  ;;  %1257 = vadd.xlane.f32.xlu0 %v1256_v12 }
 0x312   : > { %v1205_v6 = vmul.f32 1.442695, %v1165_v5  ;;  %v1253_v22 = vsel %vm353_vm0, %v4043_v17, 0.0 }
 0x313   : > { %1254 = vadd.xlane.f32.xlu1 %v1253_v22  ;;  %v1093_v7 = vpop.xlane.xlu1 %1092 }
 0x314   : > { %3350 = vpow2.f32 %v1205_v6  ;;  %v1167_v4 = vsub.f32 %v3938_v33, %v1093_v7 }
 0x315   : > { %v4047_v9 = vpop.eup %3342 }
 0x316   : > { %v1262_v15 = vsel %vm353_vm0, %v4047_v9, 0.0  ;;  %v1209_v6 = vmul.f32 1.442695, %v1167_v4 }
 0x317   : > { %1263 = vadd.xlane.f32.xlu0 %v1262_v15  ;;  %v1099_v28 = vpop.xlane.xlu1 %1098 }
 0x318   : > { %v1169_v16 = vsub.f32 %v3944_v36, %v1099_v28 }
 0x319   : > { %v4052_v18 = vpop.eup %3344 }
 0x31a   : > { %v1213_v23 = vmul.f32 1.442695, %v1169_v16  ;;  %v1259_v25 = vsel %vm353_vm0, %v4052_v18, 0.0  ;;  %v4056_v27 = vpop.eup %3346 }
 0x31b   : > { %1260 = vadd.xlane.f32.xlu1 %v1259_v25  ;;  %v1105_v29 = vpop.xlane.xlu1 %1104  ;;  %v1265_v10 = vsel %vm353_vm0, %v4056_v27, 0.0 }
 0x31c   : > { %3352 = vpow2.f32 %v1213_v23  ;;  %v1171_v30 = vsub.f32 %v3950_v39, %v1105_v29 }
 0x31d   : > { %v4061_v13 = vpop.eup %3348 }
 0x31e   : > { %v1217_v46 = vmul.f32 1.442695, %v1171_v30  ;;  %v1271_v24 = vsel %vm353_vm0, %v4061_v13, 0.0 }
 0x31f   : > { %1266 = vadd.xlane.f32.xlu1 %v1265_v10  ;;  %v1111_v36 = vpop.xlane.xlu1 %1110 }
 0x320   : > { %3354 = vpow2.f32 %v1217_v46  ;;  %v1173_v19 = vsub.f32 %v3958_v45, %v1111_v36 }
 0x321   : > { %v4066_v31 = vpop.eup %3350 }
 0x322   : > { %v1221_v20 = vmul.f32 1.442695, %v1173_v19  ;;  %v1277_v39 = vsel %vm353_vm0, %v4066_v31, 0.0 }
 0x323   : > { %1272 = vadd.xlane.f32.xlu1 %v1271_v24  ;;  %v1117_v30 = vpop.xlane.xlu1 %1116 }
 0x324   : > { %3356 = vpow2.f32 %v1221_v20  ;;  %v1175_v20 = vsub.f32 %v3964_v47, %v1117_v30 }
 0x327   : > { %1278 = vadd.xlane.f32.xlu1 %v1277_v39 }
 0x329   : > { %v4070_v34 = vpop.eup %3352 }
 0x32a   : > { %v1289_v37 = vsel %vm353_vm0, %v4070_v34, 0.0 }
 0x32b   : > { %1290 = vadd.xlane.f32.xlu1 %v1289_v37  ;;  %v1123_v37 = vpop.xlane.xlu1 %1122 }
 0x32d   : > { %v4074_v41 = vpop.eup %3354 }
 0x32e   : > { %v1295_v45 = vsel %vm353_vm0, %v4074_v41, 0.0 }
 0x32f   : > { %1296 = vadd.xlane.f32.xlu1 %v1295_v45 }
 0x331   : > { %v4078_v48 = vpop.eup %3356 }
 0x332   : > { %v1301_v50 = vsel %vm353_vm0, %v4078_v48, 0.0 }
 0x333   : > { %1302 = vadd.xlane.f32.xlu1 %v1301_v50 }
 0x33c   : > { %v1078_v56 = vpop.xlane.xlu0 %1077 }
 0x33d   : > { %v1162_v54 = vsub.f32 %v3916_v14, %v1078_v56  ;;  %v1225_v56 = vmul.f32 1.442695, %v1175_v20 }
 0x33f   : > { %v1199_v63 = vmul.f32 1.442695, %v1162_v54  ;;  %v1177_v54 = vsub.f32 %v3970_v55, %v1123_v37  ;;  %v1129_v55 = vpop.xlane.xlu1 %1128 }
 0x340   : > { %v1084_v42 = vpop.xlane.xlu0 %1083  ;;  %v1179_v4 = vsub.f32 %v3976_v53, %v1129_v55 }
 0x341   : > { %3358 = vpow2.f32 %v1199_v63  ;;  %v1164_v0 = vsub.f32 %v3924_v21, %v1084_v42 }
 0x343   : > { %v1203_v3 = vmul.f32 1.442695, %v1164_v0  ;;  %v1229_v0 = vmul.f32 1.442695, %v1177_v54 }
 0x344   : > { %v1090_v8 = vpop.xlane.xlu0 %1089  ;;  %1509 = vrot.lane.b32.xlu1 %v3807_v52, %s3509_s10 }
 0x345   : > { %3360 = vpow2.f32 %v1203_v3  ;;  %v1166_v60 = vsub.f32 %v3930_v26, %v1090_v8 }
 0x347   : > { %v1207_v5 = vmul.f32 1.442695, %v1166_v60 }
 0x348   : > { %v1096_v12 = vpop.xlane.xlu0 %1095 }
 0x349   : > { %3362 = vpow2.f32 %v1207_v5  ;;  %v1168_v14 = vsub.f32 %v3936_v32, %v1096_v12 }
 0x34b   : > { %v1211_v22 = vmul.f32 1.442695, %v1168_v14 }
 0x34c   : > { %v1102_v15 = vpop.xlane.xlu0 %1101 }
 0x34d   : > { %3364 = vpow2.f32 %v1211_v22  ;;  %v1170_v21 = vsub.f32 %v3942_v35, %v1102_v15  ;;  %v1135_v22 = vpop.xlane.xlu1 %1134 }
 0x34e   : > { %v4090_v28 = vpop.eup %3358  ;;  %3366 = vpow2.f32 %v1209_v6 }
 0x34f   : > { %v1215_v52 = vmul.f32 1.442695, %v1170_v21  ;;  %v1268_v26 = vsel %vm353_vm0, %v4090_v28, 0.0 }
 0x350   : > { %v1108_v16 = vpop.xlane.xlu0 %1107  ;;  %1269 = vadd.xlane.f32.xlu0 %v1268_v26 }
 0x351   : > { %v1172_v33 = vsub.f32 %v3948_v38, %v1108_v16  ;;  %3368 = vpow2.f32 %v1215_v52  ;;  %v1181_v16 = vsub.f32 %v3982_v59, %v1135_v22 }
 0x352   : > { %v4095_v7 = vpop.eup %3360 }
 0x353   : > { %v1219_v32 = vmul.f32 1.442695, %v1172_v33  ;;  %v1274_v23 = vsel %vm353_vm0, %v4095_v7, 0.0  ;;  %v1237_v30 = vmul.f32 1.442695, %v1181_v16 }
 0x354   : > { %v1114_v25 = vpop.xlane.xlu0 %1113  ;;  %1275 = vadd.xlane.f32.xlu0 %v1274_v23 }
 0x355   : > { %v1174_v35 = vsub.f32 %v3954_v43, %v1114_v25  ;;  %3370 = vpow2.f32 %v1219_v32 }
 0x356   : > { %v4100_v29 = vpop.eup %3362 }
 0x357   : > { %v1223_v46 = vmul.f32 1.442695, %v1174_v35  ;;  %v1280_v10 = vsel %vm353_vm0, %v4100_v29, 0.0 }
 0x358   : > { %v1120_v38 = vpop.xlane.xlu0 %1119  ;;  %1281 = vadd.xlane.f32.xlu0 %v1280_v10 }
 0x359   : > { %v1176_v36 = vsub.f32 %v3962_v49, %v1120_v38  ;;  %3372 = vpow2.f32 %v1223_v46 }
 0x35a   : > { %v4105_v19 = vpop.eup %3364 }
 0x35b   : > { %v1227_v24 = vmul.f32 1.442695, %v1176_v36  ;;  %v1286_v43 = vsel %vm353_vm0, %v4105_v19, 0.0  ;;  %v4110_v39 = vpop.eup %3366  ;;  %v1141_v36 = vpop.xlane.xlu1 %1140 }
 0x35c   : > { %v1126_v45 = vpop.xlane.xlu0 %1125  ;;  %1287 = vadd.xlane.f32.xlu0 %v1286_v43  ;;  %v1283_v47 = vsel %vm353_vm0, %v4110_v39, 0.0  ;;  %v1183_v20 = vsub.f32 %v3988_v62, %v1141_v36 }
 0x35d   : > { %v1178_v50 = vsub.f32 %v3968_v51, %v1126_v45  ;;  %3374 = vpow2.f32 %v1227_v24 }
 0x35e   : > { %v4116_v63 = vpop.eup %3368  ;;  %v1241_v37 = vmul.f32 1.442695, %v1183_v20 }
 0x35f   : > { %v1231_v49 = vmul.f32 1.442695, %v1178_v50  ;;  %v1292_v51 = vsel %vm353_vm0, %v4116_v63, 0.0 }
 0x360   : > { %v1132_v42 = vpop.xlane.xlu0 %1131  ;;  %1284 = vadd.xlane.f32.xlu0 %v1283_v47 }
 0x361   : > { %3376 = vpow2.f32 %v1231_v49  ;;  %v1180_v3 = vsub.f32 %v3974_v57, %v1132_v42  ;;  %v1233_v57 = vmul.f32 1.442695, %v1179_v4 }
 0x362   : > { %3378 = vpow2.f32 %v1225_v56  ;;  %v4121_v8 = vpop.eup %3370 }
 0x363   : > { %3380 = vpow2.f32 %v1229_v0  ;;  %v1235_v5 = vmul.f32 1.442695, %v1180_v3  ;;  %v1298_v12 = vsel %vm353_vm0, %v4121_v8, 0.0 }
 0x364   : > { %v1138_v60 = vpop.xlane.xlu0 %1137  ;;  %1293 = vadd.xlane.f32.xlu0 %v1292_v51 }
 0x365   : > { %3382 = vpow2.f32 %v1235_v5  ;;  %v1182_v15 = vsub.f32 %v3980_v58, %v1138_v60 }
 0x366   : > { %v4126_v14 = vpop.eup %3372  ;;  %3384 = vpow2.f32 %v1233_v57 }
 0x367   : > { %v1304_v21 = vsel %vm353_vm0, %v4126_v14, 0.0  ;;  %v1239_v33 = vmul.f32 1.442695, %v1182_v15 }
 0x368   : > { %v1144_v6 = vpop.xlane.xlu0 %1143  ;;  %1299 = vadd.xlane.f32.xlu0 %v1298_v12 }
 0x369   : > { %3386 = vpow2.f32 %v1239_v33  ;;  %v1184_v46 = vsub.f32 %v3986_v61, %v1144_v6  ;;  %v1147_v61 = vpop.xlane.xlu1 %1146 }
 0x36a   : > { %v4131_v52 = vpop.eup %3374  ;;  %v1185_v62 = vsub.f32 %v3994_v2, %v1147_v61 }
 0x36b   : > { %v1310_v32 = vsel %vm353_vm0, %v4131_v52, 0.0  ;;  %v1243_v24 = vmul.f32 1.442695, %v1184_v46 }
 0x36c   : > { %v1150_v26 = vpop.xlane.xlu0 %1149  ;;  %1305 = vadd.xlane.f32.xlu0 %v1304_v21 }
 0x36d   : > { %v1186_v45 = vsub.f32 %v3992_v1, %v1150_v26  ;;  %v1153_v42 = vpop.xlane.xlu1 %1152  ;;  %v1245_v1 = vmul.f32 1.442695, %v1185_v62 }
 0x36e   : > { %v4133_v53 = vpop.eup %3376  ;;  %v1187_v3 = vsub.f32 %v4000_v40, %v1153_v42 }
 0x36f   : > { %v1316_v23 = vsel %vm353_vm0, %v4133_v53, 0.0  ;;  %v4140_v58 = vpop.eup %3378  ;;  %v1247_v54 = vmul.f32 1.442695, %v1186_v45 }
 0x370   : > { %v1156_v25 = vpop.xlane.xlu0 %1155  ;;  %1311 = vadd.xlane.f32.xlu0 %v1310_v32  ;;  %1317 = vadd.xlane.f32.xlu1 %v1316_v23  ;;  %v1307_v10 = vsel %vm353_vm0, %v4140_v58, 0.0  ;;  %v4146_v38 = vpop.eup %3380  ;;  %v1249_v60 = vmul.f32 1.442695, %v1187_v3 }
 0x371   : > { %v1188_v35 = vsub.f32 %v3998_v44, %v1156_v25  ;;  %v1313_v44 = vsel %vm353_vm0, %v4146_v38, 0.0 }
 0x372   : > { %v4151_v43 = vpop.eup %3382 }
 0x373   : > { %v1251_v59 = vmul.f32 1.442695, %v1188_v35  ;;  %v1322_v50 = vsel %vm353_vm0, %v4151_v43, 0.0  ;;  %v4156_v56 = vpop.eup %3384 }
 0x374   : > { %1308 = vadd.xlane.f32.xlu0 %v1307_v10  ;;  %v1319_v49 = vsel %vm353_vm0, %v4156_v56, 0.0 }
 0x375   : > { %3388 = vpow2.f32 %v1251_v59 }
 0x376   : > { %3390 = vpow2.f32 %v1237_v30  ;;  %v4161_v47 = vpop.eup %3386 }
 0x377   : > { %3392 = vpow2.f32 %v1243_v24  ;;  %v1328_v2 = vsel %vm353_vm0, %v4161_v47, 0.0 }
 0x378   : > { %1314 = vadd.xlane.f32.xlu0 %v1313_v44  ;;  %3394 = vpow2.f32 %v1241_v37 }
 0x379   : > { %3396 = vpow2.f32 %v1247_v54 }
 0x37a   : > { %3398 = vpow2.f32 %v1245_v1 }
 0x37b   : > { %3400 = vpow2.f32 %v1249_v60 }
 0x37c   : > { %1323 = vadd.xlane.f32.xlu0 %v1322_v50 }
 0x380   : > { %1320 = vadd.xlane.f32.xlu0 %v1319_v49 }
 0x382   : > { %v4163_v0 = vpop.eup %3388 }
 0x383   : > { %v1346_v51 = vsel %vm353_vm0, %v4163_v0, 0.0  ;;  %v4170_v55 = vpop.eup %3390 }
 0x384   : > { %1347 = vadd.xlane.f32.xlu1 %v1346_v51  ;;  %1329 = vadd.xlane.f32.xlu0 %v1328_v2  ;;  %v1325_v4 = vsel %vm353_vm0, %v4170_v55, 0.0  ;;  %v4174_v5 = vpop.eup %3392 }
 0x385   : > { %v1334_v40 = vsel %vm353_vm0, %v4174_v5, 0.0  ;;  %v4178_v12 = vpop.eup %3394 }
 0x386   : > { %v1331_v6 = vsel %vm353_vm0, %v4178_v12, 0.0  ;;  %v4182_v57 = vpop.eup %3396 }
 0x387   : > { %v1340_v22 = vsel %vm353_vm0, %v4182_v57, 0.0  ;;  %v4186_v15 = vpop.eup %3398 }
 0x388   : > { %1326 = vadd.xlane.f32.xlu0 %v1325_v4  ;;  %v1337_v21 = vsel %vm353_vm0, %v4186_v15, 0.0  ;;  %v4190_v26 = vpop.eup %3400  ;;  %v1857_v4 = vld [vmem:[%s4836_s3 + $0x18] sm:$0xff] }
 0x389   : > { %v1343_v16 = vsel %vm353_vm0, %v4190_v26, 0.0  ;;  %3232 = vmatprep.subr.mxu1 %v1857_v4 }
 0x38a   : > { %3233 = vmatpush3.msra.mxu1 %v1857_v4 }
 0x38c   : > { %1335 = vadd.xlane.f32.xlu0 %v1334_v40  ;;  %v1856_v40 = vld [vmem:[%s4836_s3 + $0x10] sm:$0xff] }
 0x38d   : > { %3234 = vmatprep.subr.mxu1 %v1856_v40 }
 0x38e   : > { %3235 = vmatpush3.msra.mxu1 %v1856_v40 }
 0x390   : > { %1332 = vadd.xlane.f32.xlu0 %v1331_v6 }
 0x394   : > { %1341 = vadd.xlane.f32.xlu0 %v1340_v22 }
 0x398   : > { %1338 = vadd.xlane.f32.xlu0 %v1337_v21 }
 0x39a   : > { %v1258_v32 = vpop.xlane.xlu0 %1257 }
 0x39c   : > { %1344 = vadd.xlane.f32.xlu0 %v1343_v16  ;;  %v1255_v33 = vpop.xlane.xlu1 %1254 }
 0x39d   : > { %3402 = vrcp.f32 %v1255_v33 }
 0x39e   : > { %3404 = vrcp.f32 %v1258_v32 }
 0x3a0   : > { %v1264_v25 = vpop.xlane.xlu0 %1263 }
 0x3a4   : > { %v1261_v23 = vpop.xlane.xlu1 %1260 }
 0x3a5   : > { %3406 = vrcp.f32 %v1261_v23 }
 0x3a6   : > { %3408 = vrcp.f32 %v1264_v25 }
 0x3a8   : > { %v1267_v35 = vpop.xlane.xlu1 %1266 }
 0x3a9   : > { %3410 = vrcp.f32 %v1267_v35 }
 0x3aa   : > { %v3403_v30 = vpop.eup %3402 }
 0x3ab   : > { %v1381_v46 = vmul.f32 %v3403_v30, %v1255_v33  ;;  %v3405_v44 = vpop.eup %3404 }
 0x3ac   : > { %v1273_v59 = vpop.xlane.xlu1 %1272  ;;  %v1382_v45 = vmul.f32 %v3405_v44, %v1258_v32 }
 0x3ad   : > { %v1413_v10 = vsub.f32 2.0, %v1381_v46  ;;  %3412 = vrcp.f32 %v1273_v59 }
 0x3ae   : > { %v1414_v42 = vsub.f32 2.0, %v1382_v45 }
 0x3af   : > { %v1445_v36 = vmul.f32 %v3403_v30, %v1413_v10 }
 0x3b0   : > { %v1279_v20 = vpop.xlane.xlu1 %1278  ;;  %v1446_v60 = vmul.f32 %v3405_v44, %v1414_v42 }
 0x3b1   : > { %v1477_v24 = vmul.f32 %v4043_v17, %v1445_v36  ;;  %3414 = vrcp.f32 %v1279_v20 }
 0x3b2   : > { %v3407_v61 = vpop.eup %3406  ;;  %v1478_v16 = vmul.f32 %v4038_v11, %v1446_v60 }
 0x3b3   : > { %3184 = vmatprep.mubr.msk.f32.mxu0 %vm353_vm0, %v1477_v24  ;;  %v3409_v50 = vpop.eup %3408  ;;  %v1383_v62 = vmul.f32 %v3407_v61, %v1261_v23 }
 0x3b4   : > { %v4196_v37 = vpop.xlane.xlu1 %1290  ;;  %v1384_v1 = vmul.f32 %v3409_v50, %v1264_v25 }
 0x3b5   : > { %v1415_v3 = vsub.f32 2.0, %v1383_v62 }
 0x3b6   : > { %v3411_v54 = vpop.eup %3410  ;;  %v1416_v17 = vsub.f32 2.0, %v1384_v1 }
 0x3b7   : > { %v1385_v51 = vmul.f32 %v3411_v54, %v1267_v35  ;;  %v1447_v6 = vmul.f32 %v3407_v61, %v1415_v3 }
 0x3b8   : > { %v4198_v49 = vpop.xlane.xlu1 %1296  ;;  %v1448_v33 = vmul.f32 %v3409_v50, %v1416_v17 }
 0x3b9   : > { %v1417_v22 = vsub.f32 2.0, %v1385_v51  ;;  %v1479_v32 = vmul.f32 %v4052_v18, %v1447_v6 }
 0x3ba   : > { %v1480_v25 = vmul.f32 %v4047_v9, %v1448_v33  ;;  %v3413_v18 = vpop.eup %3412 }
 0x3bb   : > { %v1449_v23 = vmul.f32 %v3411_v54, %v1417_v22  ;;  %v1387_v10 = vmul.f32 %v3413_v18, %v1273_v59 }
 0x3bc   : > { %v4200_v2 = vpop.xlane.xlu1 %1302 }
 0x3bd   : > { %v1481_v35 = vmul.f32 %v4056_v27, %v1449_v23  ;;  %v1419_v24 = vsub.f32 2.0, %v1387_v10 }
 0x3be   : > { %v3415_v36 = vpop.eup %3414 }
 0x3bf   : > { %v1389_v44 = vmul.f32 %v3415_v36, %v1279_v20  ;;  %v1451_v54 = vmul.f32 %v3413_v18, %v1419_v24 }
 0x3c0   : > { %v1510_v21 = vpop.permute.xlu1 %1509 }
 0x3c1   : > { %3182 = vmatprep.subr.mxu0 %v1510_v21  ;;  %v1421_v42 = vsub.f32 2.0, %v1389_v44  ;;  %v1483_v20 = vmul.f32 %v4061_v13, %v1451_v54 }
 0x3c2   : > { %3183 = vmatpush3.msra.mxu0 %v1510_v21 }
 0x3c3   : > { %3185 = vmatmul.mubr.msk.f32.vlgmr.msra.gmra.mxu0 %vm353_vm0, %v1478_v16  ;;  %v1453_v4 = vmul.f32 %v3415_v36, %v1421_v42 }
 0x3c4   : > { %3187 = vmatprep.mubr.msk.f32.mxu0 %vm353_vm0, %v1479_v32 }
 0x3c7   : > { %3188 = vmatmul.mubr.msk.f32.gmra.mxu0 %vm353_vm0, %v1480_v25 }
 0x3c8   : > { %3190 = vmatprep.mubr.msk.f32.mxu0 %vm353_vm0, %v1481_v35 }
 0x3d9   : > { %v1270_v11 = vpop.xlane.xlu0 %1269 }
 0x3da   : > { %3416 = vrcp.f32 %v1270_v11 }
 0x3dd   : > { %v1276_v30 = vpop.xlane.xlu0 %1275 }
 0x3de   : > { %3418 = vrcp.f32 %v1276_v30 }
 0x3e1   : > { %v1282_v46 = vpop.xlane.xlu0 %1281 }
 0x3e2   : > { %3420 = vrcp.f32 %v1282_v46 }
 0x3e3   : > { %3422 = vrcp.f32 %v4196_v37 }
 0x3e5   : > { %v1288_v9 = vpop.xlane.xlu0 %1287 }
 0x3e6   : > { %3424 = vrcp.f32 %v1288_v9 }
 0x3e7   : > { %v3417_v27 = vpop.eup %3416  ;;  %3426 = vrcp.f32 %v4198_v49 }
 0x3e8   : > { %v1386_v61 = vmul.f32 %v3417_v27, %v1270_v11 }
 0x3e9   : > { %v1285_v45 = vpop.xlane.xlu0 %1284 }
 0x3ea   : > { %v1418_v50 = vsub.f32 2.0, %v1386_v61  ;;  %3428 = vrcp.f32 %v1285_v45 }
 0x3eb   : > { %v3419_v62 = vpop.eup %3418  ;;  %3430 = vrcp.f32 %v4200_v2 }
 0x3ec   : > { %v1450_v59 = vmul.f32 %v3417_v27, %v1418_v50  ;;  %v1388_v1 = vmul.f32 %v3419_v62, %v1276_v30 }
 0x3ed   : > { %v1294_v3 = vpop.xlane.xlu0 %1293 }
 0x3ee   : > { %v1482_v51 = vmul.f32 %v4090_v28, %v1450_v59  ;;  %v1420_v60 = vsub.f32 2.0, %v1388_v1  ;;  %3432 = vrcp.f32 %v1294_v3  ;;  %v1485_v28 = vmul.f32 %v4066_v31, %v1453_v4 }
 0x3ef   : > { %v3421_v17 = vpop.eup %3420 }
 0x3f0   : > { %v3423_v40 = vpop.eup %3422  ;;  %v1452_v6 = vmul.f32 %v3419_v62, %v1420_v60  ;;  %v1390_v22 = vmul.f32 %v3421_v17, %v1282_v46  ;;  %3191 = vmatmul.mubr.msk.f32.gmra.mxu0 %vm353_vm0, %v1482_v51 }
 0x3f1   : > { %v1300_v21 = vpop.xlane.xlu0 %1299  ;;  %3193 = vmatprep.mubr.msk.f32.mxu0 %vm353_vm0, %v1483_v20  ;;  %v1393_v23 = vmul.f32 %v3423_v40, %v4196_v37 }
 0x3f2   : > { %v1484_v16 = vmul.f32 %v4095_v7, %v1452_v6  ;;  %v1422_v33 = vsub.f32 2.0, %v1390_v22  ;;  %3434 = vrcp.f32 %v1300_v21 }
 0x3f3   : > { %v3425_v32 = vpop.eup %3424  ;;  %v1425_v7 = vsub.f32 2.0, %v1393_v23 }
 0x3f4   : > { %v1454_v25 = vmul.f32 %v3421_v17, %v1422_v33  ;;  %v1392_v13 = vmul.f32 %v3425_v32, %v1288_v9  ;;  %3194 = vmatmul.mubr.msk.f32.gmra.mxu0 %vm353_vm0, %v1484_v16  ;;  %v3427_v35 = vpop.eup %3426 }
 0x3f5   : > { %v1306_v11 = vpop.xlane.xlu0 %1305  ;;  %3196 = vmatprep.mubr.msk.f32.mxu0 %vm353_vm0, %v1485_v28  ;;  %v1395_v10 = vmul.f32 %v3427_v35, %v4198_v49  ;;  %v1457_v44 = vmul.f32 %v3423_v40, %v1425_v7 }
 0x3f6   : > { %v1486_v30 = vmul.f32 %v4100_v29, %v1454_v25  ;;  %3436 = vrcp.f32 %v1306_v11  ;;  %v1424_v46 = vsub.f32 2.0, %v1392_v13 }
 0x3f7   : > { %v3429_v18 = vpop.eup %3428  ;;  %v1427_v50 = vsub.f32 2.0, %v1395_v10  ;;  %v1489_v1 = vmul.f32 %v4070_v34, %v1457_v44  ;;  %v1855_v34 = vld [vmem:[%s4836_s3 + $0x8] sm:$0xff] }
 0x3f8   : > { %v1391_v36 = vmul.f32 %v3429_v18, %v1285_v45  ;;  %3197 = vmatmul.mubr.msk.f32.gmra.mxu0 %vm353_vm0, %v1486_v30  ;;  %v3431_v31 = vpop.eup %3430  ;;  %v1456_v61 = vmul.f32 %v3425_v32, %v1424_v46  ;;  %3236 = vmatprep.subr.mxu1 %v1855_v34 }
 0x3f9   : > { %v1312_v37 = vpop.xlane.xlu0 %1311  ;;  %v1318_v9 = vpop.xlane.xlu1 %1317  ;;  %v1397_v29 = vmul.f32 %v3431_v31, %v4200_v2  ;;  %v1459_v60 = vmul.f32 %v3427_v35, %v1427_v50  ;;  %3237 = vmatpush3.msra.mxu1 %v1855_v34 }
 0x3fa   : > { %v1423_v27 = vsub.f32 2.0, %v1391_v36  ;;  %3438 = vrcp.f32 %v1312_v37  ;;  %v1488_v51 = vmul.f32 %v4105_v19, %v1456_v61 }
 0x3fb   : > { %v3433_v24 = vpop.eup %3432  ;;  %3440 = vrcp.f32 %v1318_v9  ;;  %v1429_v17 = vsub.f32 2.0, %v1397_v29  ;;  %v1491_v19 = vmul.f32 %v4074_v41, %v1459_v60 }
 0x3fc   : > { %v1455_v62 = vmul.f32 %v3429_v18, %v1423_v27  ;;  %v1394_v54 = vmul.f32 %v3433_v24, %v1294_v3 }
 0x3fd   : > { %v1309_v42 = vpop.xlane.xlu0 %1308  ;;  %v1461_v6 = vmul.f32 %v3431_v31, %v1429_v17 }
 0x3fe   : > { %v1487_v49 = vmul.f32 %v4110_v39, %v1455_v62  ;;  %v1426_v45 = vsub.f32 2.0, %v1394_v54  ;;  %3442 = vrcp.f32 %v1309_v42 }
 0x3ff   : > { %v3435_v59 = vpop.eup %3434  ;;  %v1493_v23 = vmul.f32 %v4078_v48, %v1461_v6 }
 0x400   : > { %v1458_v20 = vmul.f32 %v3433_v24, %v1426_v45  ;;  %v1396_v4 = vmul.f32 %v3435_v59, %v1300_v21  ;;  %3199 = vmatprep.mubr.msk.f32.mxu0 %vm353_vm0, %v1487_v49 }
 0x401   : > { %v1315_v40 = vpop.xlane.xlu0 %1314  ;;  %3200 = vmatmul.mubr.msk.f32.gmra.mxu0 %vm353_vm0, %v1488_v51 }
 0x402   : > { %v1490_v2 = vmul.f32 %v4116_v63, %v1458_v20  ;;  %v1428_v3 = vsub.f32 2.0, %v1396_v4  ;;  %3444 = vrcp.f32 %v1315_v40  ;;  %3202 = vmatprep.mubr.msk.f32.mxu0 %vm353_vm0, %v1489_v1  ;;  %v1854_v63 = vld [vmem:[%s4836_s3] sm:$0xff] }
 0x403   : > { %v3437_v39 = vpop.eup %3436  ;;  %3238 = vmatprep.subr.mxu1 %v1854_v63 }
 0x404   : > { %v1460_v22 = vmul.f32 %v3435_v59, %v1428_v3  ;;  %v1398_v21 = vmul.f32 %v3437_v39, %v1306_v11  ;;  %3239 = vmatpush3.msra.mxu1 %v1854_v63 }
 0x405   : > { %v1324_v16 = vpop.xlane.xlu0 %1323  ;;  %3203 = vmatmul.mubr.msk.f32.gmra.mxu0 %vm353_vm0, %v1490_v2 }
 0x406   : > { %v1492_v33 = vmul.f32 %v4121_v8, %v1460_v22  ;;  %v1430_v32 = vsub.f32 2.0, %v1398_v21  ;;  %3446 = vrcp.f32 %v1324_v16  ;;  %3205 = vmatprep.mubr.msk.f32.mxu0 %vm353_vm0, %v1491_v19 }
 0x407   : > { %v3439_v41 = vpop.eup %3438 }
 0x408   : > { %v3441_v28 = vpop.eup %3440  ;;  %v1462_v25 = vmul.f32 %v3437_v39, %v1430_v32  ;;  %v1400_v13 = vmul.f32 %v3439_v41, %v1312_v37 }
 0x409   : > { %v1321_v35 = vpop.xlane.xlu0 %1320  ;;  %3206 = vmatmul.mubr.msk.f32.gmra.mxu0 %vm353_vm0, %v1492_v33  ;;  %v1402_v18 = vmul.f32 %v3441_v28, %v1318_v9 }
 0x40a   : > { %v1494_v11 = vmul.f32 %v4126_v14, %v1462_v25  ;;  %3448 = vrcp.f32 %v1321_v35  ;;  %3208 = vmatprep.mubr.msk.f32.mxu0 %vm353_vm0, %v1493_v23  ;;  %v1432_v30 = vsub.f32 2.0, %v1400_v13 }
 0x40b   : > { %v3443_v8 = vpop.eup %3442  ;;  %v1434_v31 = vsub.f32 2.0, %v1402_v18 }
 0x40c   : > { %v1399_v7 = vmul.f32 %v3443_v8, %v1309_v42  ;;  %v1464_v36 = vmul.f32 %v3439_v41, %v1432_v30 }
 0x40d   : > { %v1330_v46 = vpop.xlane.xlu0 %1329  ;;  %3209 = vmatmul.mubr.msk.f32.gmra.mxu0 %vm353_vm0, %v1494_v11  ;;  %v1466_v9 = vmul.f32 %v3441_v28, %v1434_v31  ;;  %v1348_v4 = vpop.xlane.xlu1 %1347 }
 0x40e   : > { %v1431_v10 = vsub.f32 2.0, %v1399_v7  ;;  %3450 = vrcp.f32 %v1330_v46  ;;  %v1496_v50 = vmul.f32 %v4131_v52, %v1464_v36 }
 0x40f   : > { %v3445_v48 = vpop.eup %3444  ;;  %v1498_v45 = vmul.f32 %v4133_v53, %v1466_v9 }
 0x410   : > { %v1463_v37 = vmul.f32 %v3443_v8, %v1431_v10  ;;  %v1401_v27 = vmul.f32 %v3445_v48, %v1315_v40 }
 0x411   : > { %v1327_v24 = vpop.xlane.xlu0 %1326 }
 0x412   : > { %v1495_v14 = vmul.f32 %v4140_v58, %v1463_v37  ;;  %v1433_v44 = vsub.f32 2.0, %v1401_v27  ;;  %3452 = vrcp.f32 %v1327_v24 }
 0x413   : > { %v3447_v61 = vpop.eup %3446 }
 0x414   : > { %v1465_v29 = vmul.f32 %v3445_v48, %v1433_v44  ;;  %v1404_v62 = vmul.f32 %v3447_v61, %v1324_v16  ;;  %3211 = vmatprep.mubr.msk.f32.mxu0 %vm353_vm0, %v1495_v14 }
 0x415   : > { %v1336_v54 = vpop.xlane.xlu0 %1335  ;;  %3212 = vmatmul.mubr.msk.f32.gmra.mxu0 %vm353_vm0, %v1496_v50 }
 0x416   : > { %v1497_v42 = vmul.f32 %v4146_v38, %v1465_v29  ;;  %3454 = vrcp.f32 %v1336_v54  ;;  %v1436_v58 = vsub.f32 2.0, %v1404_v62 }
 0x417   : > { %v3449_v49 = vpop.eup %3448 }
 0x418   : > { %v1403_v59 = vmul.f32 %v3449_v49, %v1321_v35  ;;  %3214 = vmatprep.mubr.msk.f32.mxu0 %vm353_vm0, %v1497_v42  ;;  %v1468_v60 = vmul.f32 %v3447_v61, %v1436_v58 }
 0x419   : > { %v1333_v1 = vpop.xlane.xlu0 %1332  ;;  %3215 = vmatmul.mubr.msk.f32.gmra.mxu0 %vm353_vm0, %v1498_v45 }
 0x41a   : > { %v1435_v52 = vsub.f32 2.0, %v1403_v59  ;;  %3456 = vrcp.f32 %v1333_v1  ;;  %v1500_v53 = vmul.f32 %v4151_v43, %v1468_v60 }
 0x41b   : > { %v3451_v51 = vpop.eup %3450 }
 0x41c   : > { %v1467_v17 = vmul.f32 %v3449_v49, %v1435_v52  ;;  %v1406_v20 = vmul.f32 %v3451_v51, %v1330_v46 }
 0x41d   : > { %v1342_v40 = vpop.xlane.xlu0 %1341 }
 0x41e   : > { %v1499_v38 = vmul.f32 %v4156_v56, %v1467_v17  ;;  %3458 = vrcp.f32 %v1342_v40  ;;  %v1438_v3 = vsub.f32 2.0, %v1406_v20 }
 0x41f   : > { %v3453_v2 = vpop.eup %3452  ;;  %3460 = vrcp.f32 %v1348_v4 }
 0x420   : > { %v1405_v39 = vmul.f32 %v3453_v2, %v1327_v24  ;;  %3217 = vmatprep.mubr.msk.f32.mxu0 %vm353_vm0, %v1499_v38  ;;  %v1470_v22 = vmul.f32 %v3451_v51, %v1438_v3 }
 0x421   : > { %v1339_v34 = vpop.xlane.xlu0 %1338  ;;  %3218 = vmatmul.mubr.msk.f32.gmra.mxu0 %vm353_vm0, %v1500_v53 }
 0x422   : > { %v1437_v19 = vsub.f32 2.0, %v1405_v39  ;;  %3462 = vrcp.f32 %v1339_v34  ;;  %v1502_v43 = vmul.f32 %v4161_v47, %v1470_v22 }
 0x423   : > { %v3455_v6 = vpop.eup %3454 }
 0x424   : > { %v1469_v21 = vmul.f32 %v3453_v2, %v1437_v19  ;;  %v1408_v16 = vmul.f32 %v3455_v6, %v1336_v54 }
 0x425   : > { %v1345_v63 = vpop.xlane.xlu0 %1344 }
 0x426   : > { %v1501_v56 = vmul.f32 %v4170_v55, %v1469_v21  ;;  %3464 = vrcp.f32 %v1345_v63  ;;  %v1440_v32 = vsub.f32 2.0, %v1408_v16  ;;  %v4317_v16 = vld [vmem:[%s4840_s7 + $0x38] sm:$0xff] }
 0x427   : > { %v3457_v33 = vpop.eup %3456 }
 0x428   : > { %v1407_v41 = vmul.f32 %v3457_v33, %v1333_v1  ;;  %3220 = vmatprep.mubr.msk.f32.mxu0 %vm353_vm0, %v1501_v56  ;;  %v1472_v25 = vmul.f32 %v3455_v6, %v1440_v32  ;;  %v4325_v56 = vld [vmem:[%s4840_s7 + $0x30] sm:$0xff]  ;;  %v4346_v32 = vld [vmem:[%s4840_s7 + $0x18] sm:$0xff] }
 0x429   : > { %3221 = vmatmul.mubr.msk.f32.gmra.mxu0 %vm353_vm0, %v1502_v43  ;;  %v4339_v43 = vld [vmem:[%s4840_s7 + $0x20] sm:$0xff] }
 0x42a   : > { %v1439_v28 = vsub.f32 2.0, %v1407_v41  ;;  %v1504_v18 = vmul.f32 %v4174_v5, %v1472_v25  ;;  %v4353_v41 = vld [vmem:[%s4840_s7 + $0x10] sm:$0xff] }
 0x42b   : > { %v3459_v23 = vpop.eup %3458 }
 0x42c   : > { %v3461_v13 = vpop.eup %3460  ;;  %v1471_v35 = vmul.f32 %v3457_v33, %v1439_v28  ;;  %v1410_v11 = vmul.f32 %v3459_v23, %v1342_v40  ;;  %v4332_v33 = vld [vmem:[%s4840_s7 + $0x28] sm:$0xff] }
 0x42d   : > { %v1412_v55 = vmul.f32 %v3461_v13, %v1348_v4  ;;  %v4360_v28 = vld [vmem:[%s4840_s7 + $0x8] sm:$0xff] }
 0x42e   : > { %v1503_v8 = vmul.f32 %v4178_v12, %v1471_v35  ;;  %v1442_v7 = vsub.f32 2.0, %v1410_v11  ;;  %v4376_v11 = vld [vmem:[%s4837_s4] ss:$0 sm:$0xff] }
 0x42f   : > { %v3463_v30 = vpop.eup %3462  ;;  %v1444_v48 = vsub.f32 2.0, %v1412_v55 }
 0x430   : > { %v1409_v47 = vmul.f32 %v3463_v30, %v1339_v34  ;;  %3223 = vmatprep.mubr.msk.f32.mxu0 %vm353_vm0, %v1503_v8  ;;  %v1474_v36 = vmul.f32 %v3459_v23, %v1442_v7  ;;  %v4367_v23 = vld [vmem:[%s4840_s7] sm:$0xff] }
 0x431   : > { %3224 = vmatmul.mubr.msk.f32.gmra.mxu0 %vm353_vm0, %v1504_v18  ;;  %v1476_v12 = vmul.f32 %v3461_v13, %v1444_v48 }
 0x432   : > { %v1441_v46 = vsub.f32 2.0, %v1409_v47  ;;  %v1506_v14 = vmul.f32 %v4182_v57, %v1474_v36 }
 0x433   : > { %v3465_v10 = vpop.eup %3464  ;;  %v1508_v61 = vmul.f32 %v4163_v0, %v1476_v12 }
 0x434   : > { %v1473_v31 = vmul.f32 %v3463_v30, %v1441_v46  ;;  %v1411_v37 = vmul.f32 %v3465_v10, %v1345_v63  ;;  %v3510_v63 = vmov 0.0  }
 0x435   : > { %3288 = vmatprep.subr.mxu0 %v3510_v63 }
 0x436   : > { %v1505_v27 = vmul.f32 %v4186_v15, %v1473_v31  ;;  %v1443_v24 = vsub.f32 2.0, %v1411_v37  ;;  %3289 = vmatpush3.msra.mxu0 %v4317_v16 }
 0x437   : > { %3290 = vmatprep.subr.mxu0 %v3510_v63 }
 0x438   : > { %v1475_v44 = vmul.f32 %v3465_v10, %v1443_v24  ;;  %3226 = vmatprep.mubr.msk.f32.mxu0 %vm353_vm0, %v1505_v27  ;;  %3291 = vmatpush3.msra.mxu0 %v4325_v56 }
 0x439   : > { %3227 = vmatmul.mubr.msk.f32.gmra.mxu0 %vm353_vm0, %v1506_v14  ;;  %3292 = vmatprep.subr.mxu0 %v3510_v63 }
 0x43a   : > { %v1507_v5 = vmul.f32 %v4190_v26, %v1475_v44  ;;  %3293 = vmatpush3.msra.mxu0 %v4332_v33 }
 0x43b   : > { %3294 = vmatprep.subr.mxu0 %v3510_v63 }
 0x43c   : > { %3229 = vmatprep.mubr.msk.f32.mxu0 %vm353_vm0, %v1507_v5  ;;  %3295 = vmatpush3.msra.mxu0 %v4339_v43 }
 0x43d   : > { %3230 = vmatmul.mubr.msk.f32.gmra.mxu0 %vm353_vm0, %v1508_v61  ;;  %3296 = vmatprep.subr.mxu0 %v3510_v63 }
 0x43e   : > { %3297 = vmatpush3.msra.mxu0 %v4346_v32  ;;  %3304 = vmatprep.mubr.msk.f32.mxu0 %vm3511_vm2, %v3510_v63 }
 0x43f   : > { %3298 = vmatprep.subr.mxu0 %v3510_v63 }
 0x440   : > { %3299 = vmatpush3.msra.mxu0 %v4353_v41 }
 0x441   : > { %3300 = vmatprep.subr.mxu0 %v3510_v63 }
 0x442   : > { %3301 = vmatpush3.msra.mxu0 %v4360_v28 }
 0x443   : > { %3302 = vmatprep.subr.mxu0 %v3510_v63 }
 0x444   : > { %3303 = vmatpush3.msra.mxu0 %v4367_v23 }
 0x445   : > { %3307 = vmatprep.subr.mxu0 %v3510_v63 }
 0x483   : > { %v3186_v50 = vpop.f32.mrf.mxu0 }
 0x485   : > { %v1695_v9 = vpop.f32.mrf.mxu0 }
 0x486   : > { %3240 = vmatprep.mubr.msk.f32.mxu1 %vm723_vm1, %v1695_v9 }
 0x487   : > { %v3189_v15 = vpop.f32.mrf.mxu0  ;;  %3241 = vmatmul.mubr.msk.f32.vlgmr.msra.gmra.mxu1 %vm723_vm1, %v3186_v50 }
 0x489   : > { %v1705_v57 = vpop.f32.mrf.mxu0 }
 0x48a   : > { %3243 = vmatprep.mubr.msk.f32.mxu1 %vm723_vm1, %v1705_v57 }
 0x48b   : > { %3244 = vmatmul.mubr.msk.f32.gmra.mxu1 %vm723_vm1, %v3189_v15 }
 0x4b0   : > { %v3192_v29 = vpop.f32.mrf.mxu0 }
 0x4b2   : > { %v1715_v26 = vpop.f32.mrf.mxu0 }
 0x4b3   : > { %3246 = vmatprep.mubr.msk.f32.mxu1 %vm723_vm1, %v1715_v26 }
 0x4b4   : > { %v3195_v0 = vpop.f32.mrf.mxu0  ;;  %3247 = vmatmul.mubr.msk.f32.gmra.mxu1 %vm723_vm1, %v3192_v29 }
 0x4b6   : > { %v1725_v62 = vpop.f32.mrf.mxu0 }
 0x4b7   : > { %3249 = vmatprep.mubr.msk.f32.mxu1 %vm723_vm1, %v1725_v62 }
 0x4b8   : > { %v3198_v54 = vpop.f32.mrf.mxu0  ;;  %3250 = vmatmul.mubr.msk.f32.gmra.mxu1 %vm723_vm1, %v3195_v0 }
 0x4ba   : > { %v1735_v42 = vpop.f32.mrf.mxu0 }
 0x4bb   : > { %3252 = vmatprep.mubr.msk.f32.mxu1 %vm723_vm1, %v1735_v42 }
 0x4bc   : > { %3253 = vmatmul.mubr.msk.f32.gmra.mxu1 %vm723_vm1, %v3198_v54 }
 0x4c1   : > { %v3201_v49 = vpop.f32.mrf.mxu0 }
 0x4c3   : > { %v1745_v45 = vpop.f32.mrf.mxu0 }
 0x4c4   : > { %3255 = vmatprep.mubr.msk.f32.mxu1 %vm723_vm1, %v1745_v45 }
 0x4c5   : > { %v3204_v58 = vpop.f32.mrf.mxu0  ;;  %3256 = vmatmul.mubr.msk.f32.gmra.mxu1 %vm723_vm1, %v3201_v49 }
 0x4c7   : > { %v1755_v59 = vpop.f32.mrf.mxu0 }
 0x4c8   : > { %3258 = vmatprep.mubr.msk.f32.mxu1 %vm723_vm1, %v1755_v59 }
 0x4c9   : > { %v3207_v1 = vpop.f32.mrf.mxu0  ;;  %3259 = vmatmul.mubr.msk.f32.gmra.mxu1 %vm723_vm1, %v3204_v58 }
 0x4cb   : > { %v1765_v52 = vpop.f32.mrf.mxu0 }
 0x4cc   : > { %3261 = vmatprep.mubr.msk.f32.mxu1 %vm723_vm1, %v1765_v52 }
 0x4cd   : > { %v3210_v51 = vpop.f32.mrf.mxu0  ;;  %3262 = vmatmul.mubr.msk.f32.gmra.mxu1 %vm723_vm1, %v3207_v1 }
 0x4cf   : > { %v1775_v60 = vpop.f32.mrf.mxu0 }
 0x4d0   : > { %3264 = vmatprep.mubr.msk.f32.mxu1 %vm723_vm1, %v1775_v60 }
 0x4d1   : > { %3265 = vmatmul.mubr.msk.f32.gmra.mxu1 %vm723_vm1, %v3210_v51 }
 0x4d5   : > { %v3213_v17 = vpop.f32.mrf.mxu0 }
 0x4d7   : > { %v1785_v20 = vpop.f32.mrf.mxu0 }
 0x4d8   : > { %3267 = vmatprep.mubr.msk.f32.mxu1 %vm723_vm1, %v1785_v20 }
 0x4d9   : > { %v3216_v4 = vpop.f32.mrf.mxu0  ;;  %3268 = vmatmul.mubr.msk.f32.gmra.mxu1 %vm723_vm1, %v3213_v17 }
 0x4db   : > { %v1795_v40 = vpop.f32.mrf.mxu0 }
 0x4dc   : > { %3270 = vmatprep.mubr.msk.f32.mxu1 %vm723_vm1, %v1795_v40 }
 0x4dd   : > { %3271 = vmatmul.mubr.msk.f32.gmra.mxu1 %vm723_vm1, %v3216_v4 }
 0x4e1   : > { %v3219_v38 = vpop.f32.mrf.mxu0 }
 0x4e3   : > { %v1805_v2 = vpop.f32.mrf.mxu0 }
 0x4e4   : > { %3273 = vmatprep.mubr.msk.f32.mxu1 %vm723_vm1, %v1805_v2 }
 0x4e5   : > { %3274 = vmatmul.mubr.msk.f32.gmra.mxu1 %vm723_vm1, %v3219_v38 }
 0x4e9   : > { %v3222_v53 = vpop.f32.mrf.mxu0 }
 0x4eb   : > { %v1815_v3 = vpop.f32.mrf.mxu0 }
 0x4ec   : > { %3276 = vmatprep.mubr.msk.f32.mxu1 %vm723_vm1, %v1815_v3 }
 0x4ed   : > { %3277 = vmatmul.mubr.msk.f32.gmra.mxu1 %vm723_vm1, %v3222_v53 }
 0x4f1   : > { %v3225_v39 = vpop.f32.mrf.mxu0 }
 0x4f3   : > { %v1825_v34 = vpop.f32.mrf.mxu0 }
 0x4f4   : > { %3279 = vmatprep.mubr.msk.f32.mxu1 %vm723_vm1, %v1825_v34 }
 0x4f5   : > { %3280 = vmatmul.mubr.msk.f32.gmra.mxu1 %vm723_vm1, %v3225_v39 }
 0x4f9   : > { %v3228_v19 = vpop.f32.mrf.mxu0 }
 0x4fb   : > { %v1835_v6 = vpop.f32.mrf.mxu0 }
 0x4fc   : > { %3282 = vmatprep.mubr.msk.f32.mxu1 %vm723_vm1, %v1835_v6 }
 0x4fd   : > { %v3231_v22 = vpop.f32.mrf.mxu0  ;;  %3283 = vmatmul.mubr.msk.f32.gmra.mxu1 %vm723_vm1, %v3228_v19 }
 0x4ff   : > { %v1845_v21 = vpop.f32.mrf.mxu0 }
 0x500   : > { %3285 = vmatprep.mubr.msk.f32.mxu1 %vm723_vm1, %v1845_v21 }
 0x501   : > { %3286 = vmatmul.mubr.msk.f32.gmra.mxu1 %vm723_vm1, %v3231_v22 }
 0x547   : > { %v3242_v25 = vpop.f32.mrf.mxu1 }
 0x548   : > { %v4382_v55 = vadd.f32 %v3242_v25, %v4376_v11 }
 0x549   : > { %v2027_v13 = vpop.f32.mrf.mxu1 }
 0x54a   : > { %v4379_v30 = vadd.f32 %v4376_v11, %v2027_v13  ;;  %v2256_v47 = vmul.f32 %v4382_v55, %v4382_v55  ;;  %v2187_v48 = vsel %vm353_vm0, %v4382_v55, 0.0 }
 0x54b   : > { %v3245_v35 = vpop.f32.mrf.mxu1 }
 0x54c   : > { %v2255_v7 = vmul.f32 %v4379_v30, %v4379_v30  ;;  %v2186_v46 = vsel %vm353_vm0, %v4379_v30, 0.0  ;;  %v4399_v31 = vadd.f32 %v3245_v35, %v4376_v11  ;;  %v2288_v24 = vsel %vm353_vm0, %v2256_v47, 0.0 }
 0x54d   : > { %v2037_v8 = vpop.f32.mrf.mxu1  ;;  %v2188_v27 = vadd.f32 %v2187_v48, %v2186_v46 }
 0x54e   : > { %v4385_v18 = vadd.f32 %v4376_v11, %v2037_v8  ;;  %v2287_v36 = vsel %vm353_vm0, %v2255_v7, 0.0  ;;  %v2258_v61 = vmul.f32 %v4399_v31, %v4399_v31  ;;  %v2191_v57 = vsel %vm353_vm0, %v4399_v31, 0.0 }
 0x54f   : > { %v2289_v14 = vadd.f32 %v2288_v24, %v2287_v36 }
 0x550   : > { %v2257_v10 = vmul.f32 %v4385_v18, %v4385_v18  ;;  %v2189_v37 = vsel %vm353_vm0, %v4385_v18, 0.0  ;;  %v2292_v62 = vsel %vm353_vm0, %v2258_v61, 0.0 }
 0x551   : > { %v2190_v44 = vadd.f32 %v2189_v37, %v2188_v27 }
 0x552   : > { %v2290_v12 = vsel %vm353_vm0, %v2257_v10, 0.0 }
 0x553   : > { %v2291_v9 = vadd.f32 %v2290_v12, %v2289_v14  ;;  %v2192_v26 = vadd.f32 %v2191_v57, %v2190_v44 }
 0x555   : > { %v2293_v58 = vadd.f32 %v2292_v62, %v2291_v9 }
 0x574   : > { %v3248_v5 = vpop.f32.mrf.mxu1 }
 0x575   : > { %v4408_v50 = vadd.f32 %v3248_v5, %v4376_v11 }
 0x576   : > { %v2047_v15 = vpop.f32.mrf.mxu1 }
 0x577   : > { %v4413_v29 = vadd.f32 %v4376_v11, %v2047_v15  ;;  %v2260_v54 = vmul.f32 %v4408_v50, %v4408_v50  ;;  %v2195_v52 = vsel %vm353_vm0, %v4408_v50, 0.0 }
 0x578   : > { %v3251_v0 = vpop.f32.mrf.mxu1 }
 0x579   : > { %v2193_v42 = vsel %vm353_vm0, %v4413_v29, 0.0  ;;  %v2259_v49 = vmul.f32 %v4413_v29, %v4413_v29  ;;  %v4423_v59 = vadd.f32 %v3251_v0, %v4376_v11  ;;  %v2296_v40 = vsel %vm353_vm0, %v2260_v54, 0.0 }
 0x57a   : > { %v2194_v45 = vadd.f32 %v2193_v42, %v2192_v26  ;;  %v2057_v1 = vpop.f32.mrf.mxu1 }
 0x57b   : > { %v2294_v51 = vsel %vm353_vm0, %v2259_v49, 0.0  ;;  %v4429_v60 = vadd.f32 %v4376_v11, %v2057_v1  ;;  %v2262_v53 = vmul.f32 %v4423_v59, %v4423_v59  ;;  %v2199_v22 = vsel %vm353_vm0, %v4423_v59, 0.0 }
 0x57c   : > { %v2295_v17 = vadd.f32 %v2294_v51, %v2293_v58  ;;  %v2196_v20 = vadd.f32 %v2195_v52, %v2194_v45  ;;  %v3254_v4 = vpop.f32.mrf.mxu1 }
 0x57d   : > { %v2197_v38 = vsel %vm353_vm0, %v4429_v60, 0.0  ;;  %v2261_v2 = vmul.f32 %v4429_v60, %v4429_v60  ;;  %v4445_v25 = vadd.f32 %v3254_v4, %v4376_v11  ;;  %v2300_v8 = vsel %vm353_vm0, %v2262_v53, 0.0 }
 0x57e   : > { %v2198_v3 = vadd.f32 %v2197_v38, %v2196_v20  ;;  %v2297_v39 = vadd.f32 %v2296_v40, %v2295_v17  ;;  %v2067_v34 = vpop.f32.mrf.mxu1 }
 0x57f   : > { %v2298_v19 = vsel %vm353_vm0, %v2261_v2, 0.0  ;;  %v4440_v6 = vadd.f32 %v4376_v11, %v2067_v34  ;;  %v2264_v10 = vmul.f32 %v4445_v25, %v4445_v25  ;;  %v2203_v12 = vsel %vm353_vm0, %v4445_v25, 0.0 }
 0x580   : > { %v2299_v21 = vadd.f32 %v2298_v19, %v2297_v39  ;;  %v2200_v13 = vadd.f32 %v2199_v22, %v2198_v3 }
 0x581   : > { %v2263_v35 = vmul.f32 %v4440_v6, %v4440_v6  ;;  %v2201_v7 = vsel %vm353_vm0, %v4440_v6, 0.0  ;;  %v2304_v44 = vsel %vm353_vm0, %v2264_v10, 0.0 }
 0x582   : > { %v2301_v47 = vadd.f32 %v2300_v8, %v2299_v21  ;;  %v2202_v48 = vadd.f32 %v2201_v7, %v2200_v13 }
 0x583   : > { %v2302_v46 = vsel %vm353_vm0, %v2263_v35, 0.0 }
 0x584   : > { %v2303_v27 = vadd.f32 %v2302_v46, %v2301_v47  ;;  %v2204_v5 = vadd.f32 %v2203_v12, %v2202_v48 }
 0x585   : > { %v3257_v36 = vpop.f32.mrf.mxu1 }
 0x586   : > { %v4456_v37 = vadd.f32 %v3257_v36, %v4376_v11  ;;  %v2305_v62 = vadd.f32 %v2304_v44, %v2303_v27 }
 0x587   : > { %v2077_v24 = vpop.f32.mrf.mxu1 }
 0x588   : > { %v4461_v14 = vadd.f32 %v4376_v11, %v2077_v24  ;;  %v2266_v9 = vmul.f32 %v4456_v37, %v4456_v37  ;;  %v2207_v42 = vsel %vm353_vm0, %v4456_v37, 0.0 }
 0x589   : > { %v3260_v61 = vpop.f32.mrf.mxu1 }
 0x58a   : > { %v2205_v15 = vsel %vm353_vm0, %v4461_v14, 0.0  ;;  %v2265_v57 = vmul.f32 %v4461_v14, %v4461_v14  ;;  %v4471_v26 = vadd.f32 %v3260_v61, %v4376_v11  ;;  %v2308_v51 = vsel %vm353_vm0, %v2266_v9, 0.0 }
 0x58b   : > { %v2206_v0 = vadd.f32 %v2205_v15, %v2204_v5  ;;  %v2087_v54 = vpop.f32.mrf.mxu1 }
 0x58c   : > { %v2306_v49 = vsel %vm353_vm0, %v2265_v57, 0.0  ;;  %v4477_v45 = vadd.f32 %v4376_v11, %v2087_v54  ;;  %v2268_v17 = vmul.f32 %v4471_v26, %v4471_v26  ;;  %v2211_v53 = vsel %vm353_vm0, %v4471_v26, 0.0 }
 0x58d   : > { %v2307_v58 = vadd.f32 %v2306_v49, %v2305_v62  ;;  %v2208_v1 = vadd.f32 %v2207_v42, %v2206_v0  ;;  %v3263_v52 = vpop.f32.mrf.mxu1 }
 0x58e   : > { %v2209_v20 = vsel %vm353_vm0, %v4477_v45, 0.0  ;;  %v2267_v4 = vmul.f32 %v4477_v45, %v4477_v45  ;;  %v2312_v21 = vsel %vm353_vm0, %v2268_v17, 0.0  ;;  %v4494_v13 = vadd.f32 %v3263_v52, %v4376_v11 }
 0x58f   : > { %v2210_v40 = vadd.f32 %v2209_v20, %v2208_v1  ;;  %v2309_v38 = vadd.f32 %v2308_v51, %v2307_v58  ;;  %v2097_v2 = vpop.f32.mrf.mxu1 }
 0x590   : > { %v2310_v3 = vsel %vm353_vm0, %v2267_v4, 0.0  ;;  %v4490_v39 = vadd.f32 %v4376_v11, %v2097_v2  ;;  %v2270_v36 = vmul.f32 %v4494_v13, %v4494_v13  ;;  %v2215_v24 = vsel %vm353_vm0, %v4494_v13, 0.0 }
 0x591   : > { %v2311_v34 = vadd.f32 %v2310_v3, %v2309_v38  ;;  %v2212_v19 = vadd.f32 %v2211_v53, %v2210_v40  ;;  %v3266_v22 = vpop.f32.mrf.mxu1 }
 0x592   : > { %v2213_v35 = vsel %vm353_vm0, %v4490_v39, 0.0  ;;  %v2269_v8 = vmul.f32 %v4490_v39, %v4490_v39  ;;  %v2316_v61 = vsel %vm353_vm0, %v2270_v36, 0.0  ;;  %v4512_v9 = vadd.f32 %v3266_v22, %v4376_v11 }
 0x593   : > { %v2313_v7 = vadd.f32 %v2312_v21, %v2311_v34  ;;  %v2107_v47 = vpop.f32.mrf.mxu1  ;;  %v2214_v48 = vadd.f32 %v2213_v35, %v2212_v19 }
 0x594   : > { %v2314_v46 = vsel %vm353_vm0, %v2269_v8, 0.0  ;;  %v4502_v10 = vadd.f32 %v4376_v11, %v2107_v47  ;;  %v2272_v58 = vmul.f32 %v4512_v9, %v4512_v9  ;;  %v2219_v17 = vsel %vm353_vm0, %v4512_v9, 0.0 }
 0x595   : > { %v2315_v27 = vadd.f32 %v2314_v46, %v2313_v7  ;;  %v2216_v44 = vadd.f32 %v2215_v24, %v2214_v48 }
 0x596   : > { %v2271_v12 = vmul.f32 %v4502_v10, %v4502_v10  ;;  %v2217_v15 = vsel %vm353_vm0, %v4502_v10, 0.0  ;;  %v2320_v38 = vsel %vm353_vm0, %v2272_v58, 0.0 }
 0x597   : > { %v2317_v57 = vadd.f32 %v2316_v61, %v2315_v27  ;;  %v2218_v42 = vadd.f32 %v2217_v15, %v2216_v44 }
 0x598   : > { %v2318_v62 = vsel %vm353_vm0, %v2271_v12, 0.0 }
 0x599   : > { %v3269_v5 = vpop.f32.mrf.mxu1  ;;  %v2319_v52 = vadd.f32 %v2318_v62, %v2317_v57  ;;  %v2220_v40 = vadd.f32 %v2219_v17, %v2218_v42 }
 0x59a   : > { %v4527_v20 = vadd.f32 %v3269_v5, %v4376_v11 }
 0x59b   : > { %v2117_v0 = vpop.f32.mrf.mxu1  ;;  %v2321_v34 = vadd.f32 %v2320_v38, %v2319_v52 }
 0x59c   : > { %v4518_v54 = vadd.f32 %v4376_v11, %v2117_v0  ;;  %v2274_v19 = vmul.f32 %v4527_v20, %v4527_v20  ;;  %v2223_v35 = vsel %vm353_vm0, %v4527_v20, 0.0 }
 0x59d   : > { %v3272_v49 = vpop.f32.mrf.mxu1 }
 0x59e   : > { %v2273_v1 = vmul.f32 %v4518_v54, %v4518_v54  ;;  %v2221_v4 = vsel %vm353_vm0, %v4518_v54, 0.0  ;;  %v2324_v46 = vsel %vm353_vm0, %v2274_v19, 0.0  ;;  %v4544_v48 = vadd.f32 %v3272_v49, %v4376_v11 }
 0x59f   : > { %v2127_v51 = vpop.f32.mrf.mxu1  ;;  %v2222_v3 = vadd.f32 %v2221_v4, %v2220_v40 }
 0x5a0   : > { %v2322_v2 = vsel %vm353_vm0, %v2273_v1, 0.0  ;;  %v4534_v53 = vadd.f32 %v4376_v11, %v2127_v51  ;;  %v2276_v5 = vmul.f32 %v4544_v48, %v4544_v48  ;;  %v2227_v0 = vsel %vm353_vm0, %v4544_v48, 0.0 }
 0x5a1   : > { %v2323_v22 = vadd.f32 %v2322_v2, %v2321_v34  ;;  %v2224_v7 = vadd.f32 %v2223_v35, %v2222_v3 }
 0x5a2   : > { %v2275_v8 = vmul.f32 %v4534_v53, %v4534_v53  ;;  %v2225_v36 = vsel %vm353_vm0, %v4534_v53, 0.0  ;;  %v2328_v1 = vsel %vm353_vm0, %v2276_v5, 0.0 }
 0x5a3   : > { %v2325_v24 = vadd.f32 %v2324_v46, %v2323_v22  ;;  %v2226_v44 = vadd.f32 %v2225_v36, %v2224_v7 }
 0x5a4   : > { %v2326_v12 = vsel %vm353_vm0, %v2275_v8, 0.0 }
 0x5a5   : > { %v3275_v21 = vpop.f32.mrf.mxu1  ;;  %v2327_v15 = vadd.f32 %v2326_v12, %v2325_v24  ;;  %v2228_v49 = vadd.f32 %v2227_v0, %v2226_v44 }
 0x5a6   : > { %v4559_v62 = vadd.f32 %v3275_v21, %v4376_v11 }
 0x5a7   : > { %v2137_v47 = vpop.f32.mrf.mxu1  ;;  %v2329_v4 = vadd.f32 %v2328_v1, %v2327_v15 }
 0x5a8   : > { %v4549_v27 = vadd.f32 %v4376_v11, %v2137_v47  ;;  %v2278_v40 = vmul.f32 %v4559_v62, %v4559_v62  ;;  %v2231_v3 = vsel %vm353_vm0, %v4559_v62, 0.0 }
 0x5aa   : > { %v2277_v61 = vmul.f32 %v4549_v27, %v4549_v27  ;;  %v2229_v42 = vsel %vm353_vm0, %v4549_v27, 0.0  ;;  %v2332_v35 = vsel %vm353_vm0, %v2278_v40, 0.0 }
 0x5ab   : > { %v2230_v17 = vadd.f32 %v2229_v42, %v2228_v49 }
 0x5ac   : > { %v2330_v52 = vsel %vm353_vm0, %v2277_v61, 0.0 }
 0x5ad   : > { %v3278_v57 = vpop.f32.mrf.mxu1  ;;  %v2331_v2 = vadd.f32 %v2330_v52, %v2329_v4  ;;  %v2232_v22 = vadd.f32 %v2231_v3, %v2230_v17 }
 0x5ae   : > { %v4575_v34 = vadd.f32 %v3278_v57, %v4376_v11 }
 0x5af   : > { %v2147_v58 = vpop.f32.mrf.mxu1  ;;  %v2333_v47 = vadd.f32 %v2332_v35, %v2331_v2 }
 0x5b0   : > { %v4566_v51 = vadd.f32 %v4376_v11, %v2147_v58  ;;  %v2280_v36 = vmul.f32 %v4575_v34, %v4575_v34  ;;  %v2235_v44 = vsel %vm353_vm0, %v4575_v34, 0.0 }
 0x5b2   : > { %v2279_v38 = vmul.f32 %v4566_v51, %v4566_v51  ;;  %v2233_v19 = vsel %vm353_vm0, %v4566_v51, 0.0  ;;  %v2336_v0 = vsel %vm353_vm0, %v2280_v36, 0.0 }
 0x5b3   : > { %v2234_v7 = vadd.f32 %v2233_v19, %v2232_v22 }
 0x5b4   : > { %v2334_v8 = vsel %vm353_vm0, %v2279_v38, 0.0 }
 0x5b5   : > { %v3281_v21 = vpop.f32.mrf.mxu1  ;;  %v2335_v12 = vadd.f32 %v2334_v8, %v2333_v47  ;;  %v2236_v57 = vadd.f32 %v2235_v44, %v2234_v7 }
 0x5b6   : > { %v4589_v5 = vadd.f32 %v3281_v21, %v4376_v11 }
 0x5b7   : > { %v2157_v46 = vpop.f32.mrf.mxu1  ;;  %v2337_v58 = vadd.f32 %v2336_v0, %v2335_v12 }
 0x5b8   : > { %v4584_v24 = vadd.f32 %v4376_v11, %v2157_v46  ;;  %v2282_v52 = vmul.f32 %v4589_v5, %v4589_v5  ;;  %v2239_v38 = vsel %vm353_vm0, %v4589_v5, 0.0 }
 0x5ba   : > { %v2237_v61 = vsel %vm353_vm0, %v4584_v24, 0.0  ;;  %v2281_v15 = vmul.f32 %v4584_v24, %v4584_v24  ;;  %v2340_v22 = vsel %vm353_vm0, %v2282_v52, 0.0 }
 0x5bb   : > { %v2238_v49 = vadd.f32 %v2237_v61, %v2236_v57 }
 0x5bc   : > { %v2338_v42 = vsel %vm353_vm0, %v2281_v15, 0.0 }
 0x5bd   : > { %v3284_v1 = vpop.f32.mrf.mxu1  ;;  %v2339_v4 = vadd.f32 %v2338_v42, %v2337_v58  ;;  %v2240_v3 = vadd.f32 %v2239_v38, %v2238_v49 }
 0x5be   : > { %v4600_v17 = vadd.f32 %v3284_v1, %v4376_v11 }
 0x5bf   : > { %v2167_v40 = vpop.f32.mrf.mxu1  ;;  %v2341_v47 = vadd.f32 %v2340_v22, %v2339_v4 }
 0x5c0   : > { %v4605_v2 = vadd.f32 %v4376_v11, %v2167_v40  ;;  %v2284_v21 = vmul.f32 %v4600_v17, %v4600_v17  ;;  %v2243_v36 = vsel %vm353_vm0, %v4600_v17, 0.0 }
 0x5c1   : > { %v3287_v19 = vpop.f32.mrf.mxu1 }
 0x5c2   : > { %v2241_v35 = vsel %vm353_vm0, %v4605_v2, 0.0  ;;  %v2283_v8 = vmul.f32 %v4605_v2, %v4605_v2  ;;  %v4618_v44 = vadd.f32 %v3287_v19, %v4376_v11  ;;  %v2344_v0 = vsel %vm353_vm0, %v2284_v21, 0.0 }
 0x5c3   : > { %v2242_v7 = vadd.f32 %v2241_v35, %v2240_v3  ;;  %v2177_v46 = vpop.f32.mrf.mxu1 }
 0x5c4   : > { %v2342_v12 = vsel %vm353_vm0, %v2283_v8, 0.0  ;;  %v4621_v61 = vadd.f32 %v4376_v11, %v2177_v46  ;;  %v2247_v52 = vsel %vm353_vm0, %v4618_v44, 0.0  ;;  %v2286_v4 = vmul.f32 %v4618_v44, %v4618_v44 }
 0x5c5   : > { %v2343_v15 = vadd.f32 %v2342_v12, %v2341_v47  ;;  %v2244_v57 = vadd.f32 %v2243_v36, %v2242_v7 }
 0x5c6   : > { %v2245_v42 = vsel %vm353_vm0, %v4621_v61, 0.0  ;;  %v2285_v49 = vmul.f32 %v4621_v61, %v4621_v61  ;;  %v2348_v19 = vsel %vm353_vm0, %v2286_v4, 0.0  ;;  %v2517_v4 = vld [vmem:[%s4839_s6] sm:$0x1] }
 0x5c7   : > { %v2246_v58 = vadd.f32 %v2245_v42, %v2244_v57  ;;  %v2345_v1 = vadd.f32 %v2344_v0, %v2343_v15 }
 0x5c8   : > { %v2346_v11 = vsel %vm353_vm0, %v2285_v49, 0.0 }
 0x5c9   : > { %v2248_v40 = vadd.f32 %v2247_v52, %v2246_v58  ;;  %v2347_v38 = vadd.f32 %v2346_v11, %v2345_v1 }
 0x5cb   : > { %v2249_v3 = vrot.slane %v2248_v40, 4  ;;  %v2349_v21 = vadd.f32 %v2348_v19, %v2347_v38 }
 0x5cd   : > { %v2250_v22 = vadd.f32 %v2249_v3, %v2248_v40  ;;  %v2350_v7 = vrot.slane %v2349_v21, 4 }
 0x5cf   : > { %v2251_v35 = vrot.slane %v2250_v22, 2  ;;  %v2351_v36 = vadd.f32 %v2350_v7, %v2349_v21 }
 0x5d1   : > { %v2252_v8 = vadd.f32 %v2251_v35, %v2250_v22  ;;  %v2352_v12 = vrot.slane %v2351_v36, 2 }
 0x5d3   : > { %v2253_v47 = vrot.slane %v2252_v8, 1  ;;  %v2353_v15 = vadd.f32 %v2352_v12, %v2351_v36 }
 0x5d5   : > { %v2254_v46 = vadd.f32 %v2253_v47, %v2252_v8 }
 0x5d7   : > { %3305 = vmatmul.mubr.msk.f32.vlgmr.msra.gmra.mxu0 %vm353_vm0, %v2254_v46 }
 0x5d8   : > { %3308 = vmatpush3.msra.mxu0 %v4317_v16  ;;  %3323 = vmatprep.mubr.msk.f32.mxu0 %vm3511_vm2, %v3510_v63  ;;  %v2354_v16 = vrot.slane %v2353_v15, 1 }
 0x5d9   : > { %3309 = vmatprep.subr.mxu0 %v3510_v63 }
 0x5da   : > { %3310 = vmatpush3.msra.mxu0 %v4325_v56  ;;  %v2355_v56 = vadd.f32 %v2354_v16, %v2353_v15 }
 0x5db   : > { %3311 = vmatprep.subr.mxu0 %v3510_v63 }
 0x5dc   : > { %3312 = vmatpush3.msra.mxu0 %v4332_v33 }
 0x5dd   : > { %3313 = vmatprep.subr.mxu0 %v3510_v63 }
 0x5de   : > { %3314 = vmatpush3.msra.mxu0 %v4339_v43 }
 0x5df   : > { %3315 = vmatprep.subr.mxu0 %v3510_v63 }
 0x5e0   : > { %3316 = vmatpush3.msra.mxu0 %v4346_v32 }
 0x5e1   : > { %3317 = vmatprep.subr.mxu0 %v3510_v63 }
 0x5e2   : > { %3318 = vmatpush3.msra.mxu0 %v4353_v41  ;;  %v2520_v41 = vlaneseq }
 0x5e3   : > { %3319 = vmatprep.subr.mxu0 %v3510_v63 }
 0x5e4   : > { %3320 = vmatpush3.msra.mxu0 %v4360_v28  ;;  %v2521_v1 = vshrl.u32 %v2520_v41, 7 }
 0x5e5   : > { %3321 = vmatprep.subr.mxu0 %v3510_v63  ;;  %v2515_v63 = vld [vmem:[%s4838_s5] sm:$0x1] }
 0x5e6   : > { %3322 = vmatpush3.msra.mxu0 %v4367_v23  ;;  %v2522_v28 = vsub.s32 0, %v2521_v1 }
 0x5e7   : > { %3324 = vmatmul.mubr.msk.f32.vlgmr.msra.gmra.mxu0 %vm353_vm0, %v2355_v56 }
 0x697   : > { %v2433_v33 = vpop.f32.mrf.mxu0 }
 0x698   : > { %v2510_v57 = vmul.f32 %v2433_v33, %v2433_v33 }
 0x699   : > { %v3306_v43 = vpop.f32.mrf.mxu0 }
 0x6a7   : > { %v2506_v32 = vpop.f32.mrf.mxu0 }
 0x6a8   : > { %v2511_v0 = vsub.f32 %v2506_v32, %v2510_v57 }
 0x6a9   : > { %v3325_v42 = vpop.f32.mrf.mxu0 }
 0x6aa   : > { %v2512_v49 = vmax.f32 %v2511_v0, 0.0 }
 0x6ac   : > { %v2513_v58 = vadd.f32 1e-05, %v2512_v49 }
 0x6ae   : > { %3466 = vrsqrt.f32 %v2513_v58 }
 0x6bb   : > { %v3467_v52 = vpop.eup %3466 }
 0x6bc   : > { %v2516_v23 = vmul.f32 %v3467_v52, %v2515_v63 }
 0x6be   : > { %v2518_v11 = vmul.f32 %v2516_v23, %v2433_v33  ;;  %v2523_v40 = vrot.slane %v2516_v23, %v2522_v28 }
 0x6c0   : > { %v2519_v38 = vsub.f32 %v2517_v4, %v2518_v11  ;;  %v2524_v3 = vmul.f32 %v2523_v40, %v4379_v30  ;;  %v2525_v19 = vmul.f32 %v2523_v40, %v4382_v55  ;;  %v2526_v22 = vmul.f32 %v2523_v40, %v4385_v18 }
 0x6c1   : > { %v2527_v21 = vmul.f32 %v2523_v40, %v4399_v31  ;;  %v2528_v35 = vmul.f32 %v2523_v40, %v4413_v29  ;;  %v2529_v8 = vmul.f32 %v2523_v40, %v4408_v50  ;;  %v2530_v7 = vmul.f32 %v2523_v40, %v4429_v60 }
 0x6c2   : > { %v2531_v47 = vmul.f32 %v2523_v40, %v4423_v59  ;;  %v2532_v46 = vmul.f32 %v2523_v40, %v4440_v6  ;;  %v2533_v36 = vmul.f32 %v2523_v40, %v4445_v25  ;;  %v2534_v30 = vmul.f32 %v2523_v40, %v4461_v14 }
 0x6c3   : > { %v2535_v55 = vmul.f32 %v2523_v40, %v4456_v37  ;;  %v2536_v18 = vmul.f32 %v2523_v40, %v4477_v45  ;;  %v2537_v31 = vmul.f32 %v2523_v40, %v4471_v26  ;;  %v2538_v29 = vmul.f32 %v2523_v40, %v4490_v39 }
 0x6c4   : > { %v2539_v50 = vmul.f32 %v2523_v40, %v4494_v13  ;;  %v2540_v60 = vmul.f32 %v2523_v40, %v4502_v10  ;;  %v2541_v59 = vmul.f32 %v2523_v40, %v4512_v9  ;;  %v2542_v6 = vmul.f32 %v2523_v40, %v4518_v54 }
 0x6c5   : > { %v2543_v25 = vmul.f32 %v2523_v40, %v4527_v20  ;;  %v2544_v14 = vmul.f32 %v2523_v40, %v4534_v53  ;;  %v2545_v37 = vmul.f32 %v2523_v40, %v4544_v48  ;;  %v2546_v45 = vmul.f32 %v2523_v40, %v4549_v27 }
 0x6c6   : > { %v2547_v26 = vmul.f32 %v2523_v40, %v4559_v62  ;;  %v2548_v39 = vmul.f32 %v2523_v40, %v4566_v51  ;;  %v2549_v13 = vmul.f32 %v2523_v40, %v4575_v34  ;;  %v2550_v10 = vmul.f32 %v2523_v40, %v4584_v24 }
 0x6c7   : > { %v2551_v9 = vmul.f32 %v2523_v40, %v4589_v5  ;;  %v2560_v12 = vrot.slane %v2519_v38, %v2522_v28  ;;  %v2552_v54 = vmul.f32 %v2523_v40, %v4605_v2  ;;  %v2553_v20 = vmul.f32 %v2523_v40, %v4600_v17 }
 0x6c8   : > { %v2554_v53 = vmul.f32 %v2523_v40, %v4621_v61  ;;  %v2555_v48 = vmul.f32 %v2523_v40, %v4618_v44 }
 0x6c9   : > { %v2562_v27 = vadd.f32 %v2560_v12, %v2524_v3  ;;  %v2563_v15 = vadd.f32 %v2560_v12, %v2525_v19  ;;  %v2564_v62 = vadd.f32 %v2560_v12, %v2526_v22  ;;  %v2565_v16 = vadd.f32 %v2560_v12, %v2527_v21  ;;  %v3468_v19 = vld [vmem:[%s3585_s18] sm:$0xff]  ;;  %v3469_v21 = vld [vmem:[%s3585_s18 + $0x8] sm:$0xff] }
 0x6ca   : > { %v2566_v51 = vadd.f32 %v2560_v12, %v2528_v35  ;;  %v2567_v56 = vadd.f32 %v2560_v12, %v2529_v8  ;;  %v2568_v34 = vadd.f32 %v2560_v12, %v2530_v7  ;;  %v2569_v33 = vadd.f32 %v2560_v12, %v2531_v47  ;;  %v3470_v8 = vld [vmem:[%s3585_s18 + $0x10] sm:$0xff]  ;;  %v3471_v47 = vld [vmem:[%s3585_s18 + $0x18] sm:$0xff] }
 0x6cb   : > { %v2570_v24 = vadd.f32 %v2560_v12, %v2532_v46  ;;  %v2571_v43 = vadd.f32 %v2560_v12, %v2533_v36  ;;  %v2572_v5 = vadd.f32 %v2560_v12, %v2534_v30  ;;  %v2573_v57 = vadd.f32 %v2560_v12, %v2535_v55  ;;  %v3472_v36 = vld [vmem:[%s3585_s18 + $0x20] sm:$0xff]  ;;  %v3473_v55 = vld [vmem:[%s3585_s18 + $0x28] sm:$0xff] }
 0x6cc   : > { %v2574_v32 = vadd.f32 %v2560_v12, %v2536_v18  ;;  %v2575_v2 = vadd.f32 %v2560_v12, %v2537_v31  ;;  %v2576_v17 = vadd.f32 %v2560_v12, %v2538_v29  ;;  %v2577_v0 = vadd.f32 %v2560_v12, %v2539_v50  ;;  %v3474_v31 = vld [vmem:[%s3585_s18 + $0x30] sm:$0xff]  ;;  %v3475_v50 = vld [vmem:[%s3585_s18 + $0x38] sm:$0xff] }
 0x6cd   : > { %v2578_v61 = vadd.f32 %v2560_v12, %v2540_v60  ;;  %v2579_v42 = vadd.f32 %v2560_v12, %v2541_v59  ;;  %v2580_v44 = vadd.f32 %v2560_v12, %v2542_v6  ;;  %v2581_v49 = vadd.f32 %v2560_v12, %v2543_v25  ;;  %v3476_v59 = vld [vmem:[%s3585_s18 + $0x40] sm:$0xff]  ;;  %v3477_v25 = vld [vmem:[%s3585_s18 + $0x48] sm:$0xff] }
 0x6ce   : > { %v4691_v58 = vadd.f32 %v2560_v12, %v2544_v14  ;;  %v4693_v41 = vadd.f32 %v2560_v12, %v2545_v37  ;;  %v4695_v1 = vadd.f32 %v2560_v12, %v2546_v45  ;;  %v4697_v63 = vadd.f32 %v2560_v12, %v2547_v26  ;;  %v3478_v37 = vld [vmem:[%s3585_s18 + $0x50] sm:$0xff]  ;;  %v3479_v26 = vld [vmem:[%s3585_s18 + $0x58] sm:$0xff] }
 0x6cf   : > { %v4699_v28 = vadd.f32 %v2560_v12, %v2548_v39  ;;  %v4701_v52 = vadd.f32 %v2560_v12, %v2549_v13  ;;  %v4703_v23 = vadd.f32 %v2560_v12, %v2550_v10  ;;  %v4705_v4 = vadd.f32 %v2560_v12, %v2551_v9  ;;  %v3480_v13 = vld [vmem:[%s3585_s18 + $0x60] sm:$0xff]  ;;  %v3481_v9 = vld [vmem:[%s3585_s18 + $0x68] sm:$0xff] }
 0x6d0   : > { %v4714_v11 = vadd.f32 %v2560_v12, %v2552_v54  ;;  %v4716_v40 = vadd.f32 %v2560_v12, %v2553_v20  ;;  %v4718_v38 = vadd.f32 %v2560_v12, %v2554_v53  ;;  %v4720_v3 = vadd.f32 %v2560_v12, %v2555_v48  ;;  %v3482_v54 = vld [vmem:[%s3585_s18 + $0x70] sm:$0xff]  ;;  %v3483_v53 = vld [vmem:[%s3585_s18 + $0x78] sm:$0xff] }
 0x6d1   : > { %v2594_v22 = vadd.f32 %v3468_v19, %v2562_v27  ;;  %v2595_v35 = vadd.f32 %v3469_v21, %v2563_v15  ;;  %v2596_v7 = vadd.f32 %v3470_v8, %v2564_v62  ;;  %v2597_v46 = vadd.f32 %v3471_v47, %v2565_v16  ;;  %v3484_v27 = vld [vmem:[%s3585_s18 + $0x80] sm:$0xff]  ;;  %v3485_v62 = vld [vmem:[%s3585_s18 + $0x88] sm:$0xff]  ;;  %v3498_v19 = vld [vmem:[%s3585_s18 + $0xf0] sm:$0xff] }
 0x6d2   : > { %v2598_v30 = vadd.f32 %v3472_v36, %v2566_v51  ;;  %v2599_v18 = vadd.f32 %v3473_v55, %v2567_v56  ;;  %v2600_v29 = vadd.f32 %v3474_v31, %v2568_v34  ;;  %v2601_v60 = vadd.f32 %v3475_v50, %v2569_v33  ;;  %v3486_v51 = vld [vmem:[%s3585_s18 + $0x90] sm:$0xff]  ;;  %v3487_v34 = vld [vmem:[%s3585_s18 + $0x98] sm:$0xff] }
 0x6d3   : > { %v2602_v6 = vadd.f32 %v3476_v59, %v2570_v24  ;;  %v2603_v14 = vadd.f32 %v3477_v25, %v2571_v43  ;;  %v2604_v45 = vadd.f32 %v3478_v37, %v2572_v5  ;;  %v2605_v39 = vadd.f32 %v3479_v26, %v2573_v57  ;;  %2626 = vst.msk [vmem:[%s4712_s29] sm:$0xff] %vm353_vm0, %v2594_v22  ;;  %v3488_v24 = vld [vmem:[%s3585_s18 + $0xa0] sm:$0xff]  ;;  %v3489_v5 = vld [vmem:[%s3585_s18 + $0xa8] sm:$0xff]  ;;  %v3499_v21 = vld [vmem:[%s3585_s18 + $0xf8] sm:$0xff] }
 0x6d4   : > { %2627 = vst.msk [vmem:[%s4712_s29 + $0x8] sm:$0xff] %vm353_vm0, %v2595_v35  ;;  %2628 = vst.msk [vmem:[%s4712_s29 + $0x10] sm:$0xff] %vm353_vm0, %v2596_v7  ;;  %v2606_v10 = vadd.f32 %v3480_v13, %v2574_v32  ;;  %v2607_v12 = vadd.f32 %v3481_v9, %v2575_v2  ;;  %v2608_v20 = vadd.f32 %v3482_v54, %v2576_v17  ;;  %v3490_v32 = vld [vmem:[%s3585_s18 + $0xb0] sm:$0xff]  ;;  %v3491_v17 = vld [vmem:[%s3585_s18 + $0xb8] sm:$0xff] }
 0x6d5   : > { %2629 = vst.msk [vmem:[%s4712_s29 + $0x18] sm:$0xff] %vm353_vm0, %v2597_v46  ;;  %v2609_v48 = vadd.f32 %v3483_v53, %v2577_v0  ;;  %2630 = vst.msk [vmem:[%s4712_s29 + $0x20] sm:$0xff] %vm353_vm0, %v2598_v30  ;;  %v2610_v15 = vadd.f32 %v3484_v27, %v2578_v61  ;;  %v2611_v16 = vadd.f32 %v3485_v62, %v2579_v42  ;;  %v3492_v61 = vld [vmem:[%s3585_s18 + $0xc0] sm:$0xff] }
 0x6d6   : > { %2631 = vst.msk [vmem:[%s4712_s29 + $0x28] sm:$0xff] %vm353_vm0, %v2599_v18  ;;  %2632 = vst.msk [vmem:[%s4712_s29 + $0x30] sm:$0xff] %vm353_vm0, %v2600_v29  ;;  %v2612_v56 = vadd.f32 %v3486_v51, %v2580_v44  ;;  %v2613_v33 = vadd.f32 %v3487_v34, %v2581_v49  ;;  %v2614_v43 = vadd.f32 %v3488_v24, %v4691_v58  ;;  %v3493_v44 = vld [vmem:[%s3585_s18 + $0xc8] sm:$0xff]  ;;  %v3494_v58 = vld [vmem:[%s3585_s18 + $0xd0] sm:$0xff] }
 0x6d7   : > { %2633 = vst.msk [vmem:[%s4712_s29 + $0x38] sm:$0xff] %vm353_vm0, %v2601_v60  ;;  %2634 = vst.msk [vmem:[%s4712_s29 + $0x40] sm:$0xff] %vm353_vm0, %v2602_v6  ;;  %v2615_v57 = vadd.f32 %v3489_v5, %v4693_v41  ;;  %v2616_v2 = vadd.f32 %v3490_v32, %v4695_v1  ;;  %v2617_v0 = vadd.f32 %v3491_v17, %v4697_v63  ;;  %v3495_v1 = vld [vmem:[%s3585_s18 + $0xd8] sm:$0xff] }
 0x6d8   : > { %2635 = vst.msk [vmem:[%s4712_s29 + $0x48] sm:$0xff] %vm353_vm0, %v2603_v14  ;;  %2636 = vst.msk [vmem:[%s4712_s29 + $0x50] sm:$0xff] %vm353_vm0, %v2604_v45  ;;  %v2618_v42 = vadd.f32 %v3492_v61, %v4699_v28  ;;  %v2619_v49 = vadd.f32 %v3493_v44, %v4701_v52  ;;  %v2620_v41 = vadd.f32 %v3494_v58, %v4703_v23  ;;  %v3496_v28 = vld [vmem:[%s3585_s18 + $0xe0] sm:$0xff]  ;;  %v3497_v23 = vld [vmem:[%s3585_s18 + $0xe8] sm:$0xff] }
 0x6d9   : > { %2637 = vst.msk [vmem:[%s4712_s29 + $0x58] sm:$0xff] %vm353_vm0, %v2605_v39  ;;  %2638 = vst.msk [vmem:[%s4712_s29 + $0x60] sm:$0xff] %vm353_vm0, %v2606_v10  ;;  %v2621_v63 = vadd.f32 %v3495_v1, %v4705_v4  ;;  %v2622_v52 = vadd.f32 %v3496_v28, %v4714_v11  ;;  %v2623_v4 = vadd.f32 %v3497_v23, %v4716_v40 }
 0x6da   : > { %2639 = vst.msk [vmem:[%s4712_s29 + $0x68] sm:$0xff] %vm353_vm0, %v2607_v12  ;;  %2640 = vst.msk [vmem:[%s4712_s29 + $0x70] sm:$0xff] %vm353_vm0, %v2608_v20  ;;  %v2624_v22 = vadd.f32 %v3498_v19, %v4718_v38  ;;  %v2625_v35 = vadd.f32 %v3499_v21, %v4720_v3 }
 0x6db   : > { %2641 = vst.msk [vmem:[%s4712_s29 + $0x78] sm:$0xff] %vm353_vm0, %v2609_v48  ;;  %2642 = vst.msk [vmem:[%s4712_s29 + $0x80] sm:$0xff] %vm353_vm0, %v2610_v15 }
 0x6dc   : > { %2643 = vst.msk [vmem:[%s4712_s29 + $0x88] sm:$0xff] %vm353_vm0, %v2611_v16  ;;  %2644 = vst.msk [vmem:[%s4712_s29 + $0x90] sm:$0xff] %vm353_vm0, %v2612_v56 }
 0x6dd   : > { %2645 = vst.msk [vmem:[%s4712_s29 + $0x98] sm:$0xff] %vm353_vm0, %v2613_v33  ;;  %2646 = vst.msk [vmem:[%s4712_s29 + $0xa0] sm:$0xff] %vm353_vm0, %v2614_v43 }
 0x6de   : > { %2647 = vst.msk [vmem:[%s4712_s29 + $0xa8] sm:$0xff] %vm353_vm0, %v2615_v57  ;;  %2648 = vst.msk [vmem:[%s4712_s29 + $0xb0] sm:$0xff] %vm353_vm0, %v2616_v2 }
 0x6df   : > { %2649 = vst.msk [vmem:[%s4712_s29 + $0xb8] sm:$0xff] %vm353_vm0, %v2617_v0  ;;  %2650 = vst.msk [vmem:[%s4712_s29 + $0xc0] sm:$0xff] %vm353_vm0, %v2618_v42 }
 0x6e0   : > { %2651 = vst.msk [vmem:[%s4712_s29 + $0xc8] sm:$0xff] %vm353_vm0, %v2619_v49  ;;  %2652 = vst.msk [vmem:[%s4712_s29 + $0xd0] sm:$0xff] %vm353_vm0, %v2620_v41 }
 0x6e1   : > { %2653 = vst.msk [vmem:[%s4712_s29 + $0xd8] sm:$0xff] %vm353_vm0, %v2621_v63  ;;  %2654 = vst.msk [vmem:[%s4712_s29 + $0xe0] sm:$0xff] %vm353_vm0, %v2622_v52 }
 0x6e2   : > { %2655 = vst.msk [vmem:[%s4712_s29 + $0xe8] sm:$0xff] %vm353_vm0, %v2623_v4  ;;  %2656 = vst.msk [vmem:[%s4712_s29 + $0xf0] sm:$0xff] %vm353_vm0, %v2624_v22 }
 0x6e3   : > { %2657 = vst.msk [vmem:[%s4712_s29 + $0xf8] sm:$0xff] %vm353_vm0, %v2625_v35 }
 0x6e4 PF: > { %s18_s27 = sadd.s32 1, %s3506_s27  }
 0x6e5   : > { %p15_p4 = scmp.ge.s32.totalorder %s18_s27, 4  }
 0x6e7   :  { %17 = sbr.rel (!%p15_p4) target bundleno = 1 (0x1), region = 82 }

</bundles_post_ra>
